<compile_context>
chip_gen: v5e
topology: v5e:2x2
jax: 0.10.0
libtpu: 0.0.40
codegen_flags: <defaults>
</compile_context>

<pallas_src>
import math
from functools import partial

import numpy as np
import jax
import jax.numpy as jnp
from jax.experimental import pallas as pl
from jax.experimental.pallas import tpu as pltpu  # noqa: F401  (kept for TPU-specific tuning)

NLAYERS = 3
NHEAD = 2
OUT_LANES = 128   # lane-dense width for the final conv store


# ----------------------------- Pallas kernels ------------------------------ #

def enc_size_kernel(x_ref, onehot_ref,
                    ew1_ref, eb1_ref, ew2_ref, eb2_ref,
                    sw1_ref, sb1_ref, sw2_ref, sb2_ref,
                    z_ref, logits_ref):
    """Fused encoder (per-element MLP + segment-sum pool) and size_pred MLP.

    x: (N, D); onehot: (B, N); z: (B, H); logits: (B, max_n+1).
    """
    h = jax.nn.relu(
        jnp.dot(x_ref[...], ew1_ref[...], preferred_element_type=jnp.float32)
        + eb1_ref[...])
    h = jnp.dot(h, ew2_ref[...], preferred_element_type=jnp.float32) + eb2_ref[...]
    z = jnp.dot(onehot_ref[...], h, preferred_element_type=jnp.float32)   # segment sum
    z_ref[...] = z
    s = jax.nn.relu(
        jnp.dot(z, sw1_ref[...], preferred_element_type=jnp.float32) + sb1_ref[...])
    logits_ref[...] = (
        jnp.dot(s, sw2_ref[...], preferred_element_type=jnp.float32) + sb2_ref[...])


def decoder_kernel(x_ref, bias_ref,
                   wq_ref, bq_ref, wk_ref, bk_ref, wv_ref, bv_ref,
                   wo_ref, bo_ref, w1_ref, b1_ref, w2_ref, b2_ref,
                   g1_ref, be1_ref, g2_ref, be2_ref,
                   wc_ref, bc_ref, out_ref):
    """3 post-norm TransformerEncoderLayers (nhead=2, relu FF) + Conv1d(k=1).

    Whole padded batch is a single block: x (M=B*max_n, dm).  bias (M, M) is the
    combined block-diagonal (same-batch) + key-padding additive mask.  Heads are
    handled with VPU column masks on full-width Q/K/V (no lane slicing).
    """
    x = x_ref[...]                       # (M, dm) f32
    bias = bias_ref[...]                 # (M, M)  f32
    dm = x.shape[-1]
    hd = dm // NHEAD
    scale = 1.0 / math.sqrt(hd)

    # Head column masks, built once (hoisted out of the layer/head loops).
    col = jax.lax.broadcasted_iota(jnp.int32, (1, dm), 1)
    head_masks = [
        ((col >= h * hd) & (col < (h + 1) * hd)).astype(jnp.float32)
        for h in range(NHEAD)
    ]

    def layer_norm(v, g, b):
        m = jnp.mean(v, axis=-1, keepdims=True)
        var = jnp.mean((v - m) ** 2, axis=-1, keepdims=True)
        return (v - m) * jax.lax.rsqrt(var + 1e-5) * g + b

    for l in range(NLAYERS):             # static unroll (3 layers)
        q = jnp.dot(x, wq_ref[l], preferred_element_type=jnp.float32) + bq_ref[l]
        k = jnp.dot(x, wk_ref[l], preferred_element_type=jnp.float32) + bk_ref[l]
        v = jnp.dot(x, wv_ref[l], preferred_element_type=jnp.float32) + bv_ref[l]

        concat = jnp.zeros_like(x)
        for h in range(NHEAD):           # static unroll (2 heads)
            mh = head_masks[h]
            # Masking q's columns restricts the contraction to this head's hd dims
            # (equivalent to per-head slicing, without cross-lane shuffles).
            s = jax.lax.dot_general(q * mh, k, (((1,), (1,)), ((), ())),
                                    preferred_element_type=jnp.float32) * scale + bias
            p = jax.nn.softmax(s, axis=-1)
            # p @ (v * mh) lands this head's output in its own columns; summing over
            # heads reproduces concat([head_0, head_1], axis=-1).
            concat = concat + jnp.dot(p, v * mh, preferred_element_type=jnp.float32)

        attn = jnp.dot(concat, wo_ref[l], preferred_element_type=jnp.float32) + bo_ref[l]
        x = layer_norm(x + attn, g1_ref[l], be1_ref[l])

        ff = jnp.dot(
            jax.nn.relu(
                jnp.dot(x, w1_ref[l], preferred_element_type=jnp.float32) + b1_ref[l]),
            w2_ref[l], preferred_element_type=jnp.float32) + b2_ref[l]
        x = layer_norm(x + ff, g2_ref[l], be2_ref[l])

    # Conv1d(in=dm, out=D, kernel_size=1) == x @ Wc + bc over the feature axis.
    # Wc/bc are zero-padded to 128 output lanes -> unmasked, lane-dense store.
    out_ref[...] = (
        jnp.dot(x, wc_ref[...], preferred_element_type=jnp.float32) + bc_ref[...])


# ------------------------------ JAX wrappers -------------------------------- #

def _enc_size_call(params, x, onehot_t):
    B = onehot_t.shape[0]
    H = params['enc_w2'].shape[1]
    C = params['sp_w2'].shape[1]
    return pl.pallas_call(
        enc_size_kernel,
        out_shape=(jax.ShapeDtypeStruct((B, H), jnp.float32),
                   jax.ShapeDtypeStruct((B, C), jnp.float32)),
    )(x, onehot_t,
      params['enc_w1'], params['enc_b1'], params['enc_w2'], params['enc_b2'],
      params['sp_w1'], params['sp_b1'], params['sp_w2'], params['sp_b2'])


def _decoder_call(params, x0z_flat, bias2d, wc_pad, bc_pad):
    M = x0z_flat.shape[0]
    return pl.pallas_call(
        decoder_kernel,
        out_shape=jax.ShapeDtypeStruct((M, OUT_LANES), jnp.float32),
    )(x0z_flat, bias2d,
      params['wq'], params['bq'], params['wk'], params['bk'],
      params['wv'], params['bv'], params['wo'], params['bo'],
      params['w1'], params['b1'], params['w2'], params['b2'],
      params['g1'], params['be1'], params['g2'], params['be2'],
      wc_pad, bc_pad)


@partial(jax.jit, static_argnames=('B', 'max_n'))
def _device_forward(params, x, batch, key, B, max_n):
    """Entire forward on device (single dispatch): encoder + size_pred + padded
    x0z assembly + masked transformer + 1x1 conv.  Only the ragged unpad is left
    to the host."""
    D = x.shape[-1]
    H = params['enc_w2'].shape[1]
    dm = D + H

    # ---- Encoder + size_pred (one fused pallas_call) ----
    # TODO(synk): for realistic N, pool via scalar-prefetch segment ids instead of
    # materializing the (B, N) one-hot.
    onehot_t = jax.nn.one_hot(batch, B, dtype=jnp.float32).T           # (B, N)
    z, n_logits = _enc_size_call(params, x, onehot_t)                   # (B,H), (B,C)

    # ---- n = argmax, padded-slot mask (static max_n bound) ----
    n = jnp.argmax(n_logits, axis=-1).astype(jnp.int32)                # (B,)
    slot = jnp.arange(max_n, dtype=jnp.int32)[None, :]                  # (1, max_n)
    mask = slot < n[:, None]                                            # (B, max_n) bool

    # ---- x0 ~ Normal(init_mu, |init_sigma|).rsample, one sample per (b, slot) ----
    eps = jax.random.normal(key, (B, max_n, D), dtype=jnp.float32)
    x0 = params['init_mu'] + jnp.abs(params['init_sigma']) * eps        # (B, max_n, D)

    # ---- padded x0z = [x0 | repeat_interleave(z)] with zeros on padded slots ----
    zb = jnp.broadcast_to(z[:, None, :], (B, max_n, H))
    x0z = jnp.where(mask[..., None],
                    jnp.concatenate([x0, zb], axis=-1), 0.0)            # (B, max_n, dm)
    x0z_flat = x0z.reshape(B * max_n, dm)                               # (M, dm)

    # ---- combined block-diagonal (same batch) + key-padding additive bias ----
    grp = jnp.arange(B * max_n, dtype=jnp.int32) // max_n
    same_batch = grp[:, None] == grp[None, :]
    key_valid = mask.reshape(1, B * max_n)
    bias2d = jnp.where(same_batch & key_valid, 0.0, -1e9).astype(jnp.float32)

    # ---- conv weights padded to a lane-dense 128-wide output ----
    wc_pad = jnp.zeros((dm, OUT_LANES), jnp.float32).at[:, :D].set(params['wc'])
    bc_pad = jnp.zeros((1, OUT_LANES), jnp.float32).at[:, :D].set(params['bc'])

    out_pad = _decoder_call(params, x0z_flat, bias2d, wc_pad, bc_pad)   # (M, 128)
    x_padded = out_pad[:, :D]                                           # (M, D)
    return x_padded, mask, n, n_logits, z


def autoencoder_forward(params, x, batch, sample_key, max_n):
    """z = encoder(x, batch); (xr, batchr) = decoder(z)."""
    batch = jnp.asarray(batch)
    B = int(np.asarray(batch).max()) + 1          # input is already concrete on host

    x_padded, mask, n, _, _ = _device_forward(params, x, batch, sample_key, B, max_n)

    # Single device->host sync: the compacted output has a data-dependent shape.
    n_h = np.asarray(n)
    mask_h = np.asarray(mask).reshape(-1)
    x_out = jnp.asarray(np.asarray(x_padded)[mask_h])
    batch_out = jnp.asarray(np.repeat(np.arange(B), n_h).astype(np.int32))
    return x_out, batch_out


# ------------------------------ parameter init ------------------------------ #

def init_params(key, D, H, max_n_classes, n_layers=NLAYERS):
    dm = D + H
    keys = iter(jax.random.split(key, 128))

    def nrm(shape, scale=0.1):
        return (scale * jax.random.normal(next(keys), shape)).astype(jnp.float32)

    def stack(shape, scale=0.1):
        return jnp.stack([nrm(shape, scale) for _ in range(n_layers)], axis=0)

    p = {}
    # Encoder (DeepSets stand-in; see TODO above)
    p['enc_w1'] = nrm((D, H)); p['enc_b1'] = nrm((1, H))
    p['enc_w2'] = nrm((H, H)); p['enc_b2'] = nrm((1, H))
    # Decoder.size_pred
    p['sp_w1'] = nrm((H, H)); p['sp_b1'] = nrm((1, H))
    p['sp_w2'] = nrm((H, max_n_classes)); p['sp_b2'] = nrm((1, max_n_classes))
    # Decoder.init_mu / init_sigma
    p['init_mu'] = jax.random.normal(next(keys), (D,), dtype=jnp.float32)
    p['init_sigma'] = jax.random.uniform(next(keys), (D,), dtype=jnp.float32)
    # Transformer layers (stacked over layer axis)
    p['wq'] = stack((dm, dm)); p['bq'] = stack((1, dm))
    p['wk'] = stack((dm, dm)); p['bk'] = stack((1, dm))
    p['wv'] = stack((dm, dm)); p['bv'] = stack((1, dm))
    p['wo'] = stack((dm, dm)); p['bo'] = stack((1, dm))
    p['w1'] = stack((dm, H)); p['b1'] = stack((1, H))
    p['w2'] = stack((H, dm)); p['b2'] = stack((1, dm))
    p['g1'] = jnp.ones((n_layers, 1, dm), jnp.float32)
    p['be1'] = jnp.zeros((n_layers, 1, dm), jnp.float32)
    p['g2'] = jnp.ones((n_layers, 1, dm), jnp.float32)
    p['be2'] = jnp.zeros((n_layers, 1, dm), jnp.float32)
    # Conv1d(in=dm, out=D, kernel_size=1)
    p['wc'] = nrm((dm, D)); p['bc'] = nrm((1, D))
    return p


# ---------------------------------- main ------------------------------------ #

if __name__ == "__main__":
    D, H, MAX_N, B = 4, 32, 8, 2        # dim=4, hidden_dim=32, max_n=8 (-> 9 size classes)
    key = jax.random.PRNGKey(0)
    kp, kx, ks = jax.random.split(key, 3)

    params = init_params(kp, D, H, MAX_N + 1)

    # small input set: 3 elements in batch 0, 5 in batch 1
    n_per = np.array([3, 5])
    x = jax.random.normal(kx, (int(n_per.sum()), D), dtype=jnp.float32)   # (8, 4)
    batch = jnp.asarray(np.repeat(np.arange(B), n_per).astype(np.int32))  # (8,)

    xr, batchr = autoencoder_forward(params, x, batch, ks, MAX_N)
    jax.block_until_ready(xr)
    jax.block_until_ready(batchr)

    assert xr.ndim == 2 and xr.shape[1] == D
    assert batchr.shape[0] == xr.shape[0]
    assert bool(jnp.all(jnp.isfinite(xr)))
    print("KERNEL_OK")
</pallas_src>

<mosaic_0001>
module attributes {stable_mosaic.version = 11 : i64} {
  func.func @enc_size_kernel(%arg0: memref<8x4xf32, #tpu.memory_space<vmem>>, %arg1: memref<2x8xf32, #tpu.memory_space<vmem>>, %arg2: memref<4x32xf32, #tpu.memory_space<vmem>>, %arg3: memref<1x32xf32, #tpu.memory_space<vmem>>, %arg4: memref<32x32xf32, #tpu.memory_space<vmem>>, %arg5: memref<1x32xf32, #tpu.memory_space<vmem>>, %arg6: memref<32x32xf32, #tpu.memory_space<vmem>>, %arg7: memref<1x32xf32, #tpu.memory_space<vmem>>, %arg8: memref<32x9xf32, #tpu.memory_space<vmem>>, %arg9: memref<1x9xf32, #tpu.memory_space<vmem>>, %arg10: memref<2x32xf32, #tpu.memory_space<vmem>>, %arg11: memref<2x9xf32, #tpu.memory_space<vmem>>) attributes {dimension_semantics = [], scalar_prefetch = 0 : i64, scratch_operands = 0 : i64, tpu.core_type = #tpu.core_type<tc>} {
    %c0 = arith.constant 0 : index
    %c0_0 = arith.constant 0 : index
    %0 = vector.load %arg0[%c0, %c0_0] : memref<8x4xf32, #tpu.memory_space<vmem>>, vector<8x4xf32>
    %c0_1 = arith.constant 0 : index
    %c0_2 = arith.constant 0 : index
    %1 = vector.load %arg2[%c0_1, %c0_2] : memref<4x32xf32, #tpu.memory_space<vmem>>, vector<4x32xf32>
    %cst = arith.constant dense<0.000000e+00> : vector<8x32xf32>
    %2 = tpu.matmul %0, %1, %cst {dimension_numbers = #tpu.dot_dimension_numbers<[1], [0], [0], [1], [0, 0, 1, 1], [], []>} : vector<8x4xf32>, vector<4x32xf32>, vector<8x32xf32> -> vector<8x32xf32>
    %c0_3 = arith.constant 0 : index
    %c0_4 = arith.constant 0 : index
    %3 = vector.load %arg3[%c0_3, %c0_4] : memref<1x32xf32, #tpu.memory_space<vmem>>, vector<1x32xf32>
    %4 = vector.broadcast %3 : vector<1x32xf32> to vector<8x32xf32>
    %5 = arith.addf %2, %4 : vector<8x32xf32>
    %cst_5 = arith.constant 0.000000e+00 : f32
    %6 = vector.broadcast %cst_5 : f32 to vector<8x32xf32>
    %7 = arith.maximumf %5, %6 : vector<8x32xf32>
    %c0_6 = arith.constant 0 : index
    %c0_7 = arith.constant 0 : index
    %8 = vector.load %arg4[%c0_6, %c0_7] : memref<32x32xf32, #tpu.memory_space<vmem>>, vector<32x32xf32>
    %cst_8 = arith.constant dense<0.000000e+00> : vector<8x32xf32>
    %9 = tpu.matmul %7, %8, %cst_8 {dimension_numbers = #tpu.dot_dimension_numbers<[1], [0], [0], [1], [0, 0, 1, 1], [], []>} : vector<8x32xf32>, vector<32x32xf32>, vector<8x32xf32> -> vector<8x32xf32>
    %c0_9 = arith.constant 0 : index
    %c0_10 = arith.constant 0 : index
    %10 = vector.load %arg5[%c0_9, %c0_10] : memref<1x32xf32, #tpu.memory_space<vmem>>, vector<1x32xf32>
    %11 = vector.broadcast %10 : vector<1x32xf32> to vector<8x32xf32>
    %12 = arith.addf %9, %11 : vector<8x32xf32>
    %c0_11 = arith.constant 0 : index
    %c0_12 = arith.constant 0 : index
    %13 = vector.load %arg1[%c0_11, %c0_12] : memref<2x8xf32, #tpu.memory_space<vmem>>, vector<2x8xf32>
    %cst_13 = arith.constant dense<0.000000e+00> : vector<2x32xf32>
    %14 = tpu.matmul %13, %12, %cst_13 {dimension_numbers = #tpu.dot_dimension_numbers<[1], [0], [0], [1], [0, 0, 1, 1], [], []>} : vector<2x8xf32>, vector<8x32xf32>, vector<2x32xf32> -> vector<2x32xf32>
    %c0_14 = arith.constant 0 : index
    %c0_15 = arith.constant 0 : index
    %15 = vector.load %arg10[%c0_14, %c0_15] : memref<2x32xf32, #tpu.memory_space<vmem>>, vector<2x32xf32>
    tpu.vector_store %arg10[%c0_14, %c0_15], %14 {strides = array<i32>} : memref<2x32xf32, #tpu.memory_space<vmem>>, vector<2x32xf32>,
    %c0_16 = arith.constant 0 : index
    %c0_17 = arith.constant 0 : index
    %16 = vector.load %arg6[%c0_16, %c0_17] : memref<32x32xf32, #tpu.memory_space<vmem>>, vector<32x32xf32>
    %cst_18 = arith.constant dense<0.000000e+00> : vector<2x32xf32>
    %17 = tpu.matmul %14, %16, %cst_18 {dimension_numbers = #tpu.dot_dimension_numbers<[1], [0], [0], [1], [0, 0, 1, 1], [], []>} : vector<2x32xf32>, vector<32x32xf32>, vector<2x32xf32> -> vector<2x32xf32>
    %c0_19 = arith.constant 0 : index
    %c0_20 = arith.constant 0 : index
    %18 = vector.load %arg7[%c0_19, %c0_20] : memref<1x32xf32, #tpu.memory_space<vmem>>, vector<1x32xf32>
    %19 = vector.broadcast %18 : vector<1x32xf32> to vector<2x32xf32>
    %20 = arith.addf %17, %19 : vector<2x32xf32>
    %cst_21 = arith.constant 0.000000e+00 : f32
    %21 = vector.broadcast %cst_21 : f32 to vector<2x32xf32>
    %22 = arith.maximumf %20, %21 : vector<2x32xf32>
    %c0_22 = arith.constant 0 : index
    %c0_23 = arith.constant 0 : index
    %23 = vector.load %arg8[%c0_22, %c0_23] : memref<32x9xf32, #tpu.memory_space<vmem>>, vector<32x9xf32>
    %cst_24 = arith.constant dense<0.000000e+00> : vector<2x9xf32>
    %24 = tpu.matmul %22, %23, %cst_24 {dimension_numbers = #tpu.dot_dimension_numbers<[1], [0], [0], [1], [0, 0, 1, 1], [], []>} : vector<2x32xf32>, vector<32x9xf32>, vector<2x9xf32> -> vector<2x9xf32>
    %c0_25 = arith.constant 0 : index
    %c0_26 = arith.constant 0 : index
    %25 = vector.load %arg9[%c0_25, %c0_26] : memref<1x9xf32, #tpu.memory_space<vmem>>, vector<1x9xf32>
    %26 = vector.broadcast %25 : vector<1x9xf32> to vector<2x9xf32>
    %27 = arith.addf %24, %26 : vector<2x9xf32>
    %c0_27 = arith.constant 0 : index
    %c0_28 = arith.constant 0 : index
    %28 = vector.load %arg11[%c0_27, %c0_28] : memref<2x9xf32, #tpu.memory_space<vmem>>, vector<2x9xf32>
    tpu.vector_store %arg11[%c0_27, %c0_28], %27 {strides = array<i32>} : memref<2x9xf32, #tpu.memory_space<vmem>>, vector<2x9xf32>,
    return
  }
}

module attributes {stable_mosaic.version = 11 : i64} {
  func.func @decoder_kernel(%arg0: memref<16x36xf32, #tpu.memory_space<vmem>>, %arg1: memref<16x16xf32, #tpu.memory_space<vmem>>, %arg2: memref<3x36x36xf32, #tpu.memory_space<vmem>>, %arg3: memref<3x1x36xf32, #tpu.memory_space<vmem>>, %arg4: memref<3x36x36xf32, #tpu.memory_space<vmem>>, %arg5: memref<3x1x36xf32, #tpu.memory_space<vmem>>, %arg6: memref<3x36x36xf32, #tpu.memory_space<vmem>>, %arg7: memref<3x1x36xf32, #tpu.memory_space<vmem>>, %arg8: memref<3x36x36xf32, #tpu.memory_space<vmem>>, %arg9: memref<3x1x36xf32, #tpu.memory_space<vmem>>, %arg10: memref<3x36x32xf32, #tpu.memory_space<vmem>>, %arg11: memref<3x1x32xf32, #tpu.memory_space<vmem>>, %arg12: memref<3x32x36xf32, #tpu.memory_space<vmem>>, %arg13: memref<3x1x36xf32, #tpu.memory_space<vmem>>, %arg14: memref<3x1x36xf32, #tpu.memory_space<vmem>>, %arg15: memref<3x1x36xf32, #tpu.memory_space<vmem>>, %arg16: memref<3x1x36xf32, #tpu.memory_space<vmem>>, %arg17: memref<3x1x36xf32, #tpu.memory_space<vmem>>, %arg18: memref<36x128xf32, #tpu.memory_space<vmem>>, %arg19: memref<1x128xf32, #tpu.memory_space<vmem>>, %arg20: memref<16x128xf32, #tpu.memory_space<vmem>>) attributes {dimension_semantics = [], scalar_prefetch = 0 : i64, scratch_operands = 0 : i64, tpu.core_type = #tpu.core_type<tc>} {
    %c0 = arith.constant 0 : index
    %c0_0 = arith.constant 0 : index
    %0 = vector.load %arg0[%c0, %c0_0] : memref<16x36xf32, #tpu.memory_space<vmem>>, vector<16x36xf32>
    %c0_1 = arith.constant 0 : index
    %c0_2 = arith.constant 0 : index
    %1 = vector.load %arg1[%c0_1, %c0_2] : memref<16x16xf32, #tpu.memory_space<vmem>>, vector<16x16xf32>
    %2 = tpu.iota {dimensions = array<i32: 1>} : vector<1x36xi32>
    %c0_i32 = arith.constant 0 : i32
    %3 = vector.broadcast %c0_i32 : i32 to vector<1x36xi32>
    %4 = arith.cmpi sge, %2, %3 : vector<1x36xi32>
    %c18_i32 = arith.constant 18 : i32
    %5 = vector.broadcast %c18_i32 : i32 to vector<1x36xi32>
    %6 = arith.cmpi slt, %2, %5 : vector<1x36xi32>
    %7 = arith.andi %4, %6 : vector<1x36xi1>
    %8 = arith.extui %7 : vector<1x36xi1> to vector<1x36xi32>
    %9 = arith.sitofp %8 : vector<1x36xi32> to vector<1x36xf32>
    %c18_i32_3 = arith.constant 18 : i32
    %10 = vector.broadcast %c18_i32_3 : i32 to vector<1x36xi32>
    %11 = arith.cmpi sge, %2, %10 : vector<1x36xi32>
    %c36_i32 = arith.constant 36 : i32
    %12 = vector.broadcast %c36_i32 : i32 to vector<1x36xi32>
    %13 = arith.cmpi slt, %2, %12 : vector<1x36xi32>
    %14 = arith.andi %11, %13 : vector<1x36xi1>
    %15 = arith.extui %14 : vector<1x36xi1> to vector<1x36xi32>
    %16 = arith.sitofp %15 : vector<1x36xi32> to vector<1x36xf32>
    %c0_4 = arith.constant 0 : index
    %c0_5 = arith.constant 0 : index
    %c0_6 = arith.constant 0 : index
    %17 = vector.load %arg2[%c0_4, %c0_5, %c0_6] : memref<3x36x36xf32, #tpu.memory_space<vmem>>, vector<1x36x36xf32>
    %18 = vector.shape_cast %17 : vector<1x36x36xf32> to vector<36x36xf32>
    %cst = arith.constant dense<0.000000e+00> : vector<16x36xf32>
    %19 = tpu.matmul %0, %18, %cst {dimension_numbers = #tpu.dot_dimension_numbers<[1], [0], [0], [1], [0, 0, 1, 1], [], []>} : vector<16x36xf32>, vector<36x36xf32>, vector<16x36xf32> -> vector<16x36xf32>
    %c0_7 = arith.constant 0 : index
    %c0_8 = arith.constant 0 : index
    %c0_9 = arith.constant 0 : index
    %20 = vector.load %arg3[%c0_7, %c0_8, %c0_9] : memref<3x1x36xf32, #tpu.memory_space<vmem>>, vector<1x1x36xf32>
    %21 = vector.shape_cast %20 : vector<1x1x36xf32> to vector<1x36xf32>
    %22 = vector.broadcast %21 : vector<1x36xf32> to vector<16x36xf32>
    %23 = arith.addf %19, %22 : vector<16x36xf32>
    %c0_10 = arith.constant 0 : index
    %c0_11 = arith.constant 0 : index
    %c0_12 = arith.constant 0 : index
    %24 = vector.load %arg4[%c0_10, %c0_11, %c0_12] : memref<3x36x36xf32, #tpu.memory_space<vmem>>, vector<1x36x36xf32>
    %25 = vector.shape_cast %24 : vector<1x36x36xf32> to vector<36x36xf32>
    %cst_13 = arith.constant dense<0.000000e+00> : vector<16x36xf32>
    %26 = tpu.matmul %0, %25, %cst_13 {dimension_numbers = #tpu.dot_dimension_numbers<[1], [0], [0], [1], [0, 0, 1, 1], [], []>} : vector<16x36xf32>, vector<36x36xf32>, vector<16x36xf32> -> vector<16x36xf32>
    %c0_14 = arith.constant 0 : index
    %c0_15 = arith.constant 0 : index
    %c0_16 = arith.constant 0 : index
    %27 = vector.load %arg5[%c0_14, %c0_15, %c0_16] : memref<3x1x36xf32, #tpu.memory_space<vmem>>, vector<1x1x36xf32>
    %28 = vector.shape_cast %27 : vector<1x1x36xf32> to vector<1x36xf32>
    %29 = vector.broadcast %28 : vector<1x36xf32> to vector<16x36xf32>
    %30 = arith.addf %26, %29 : vector<16x36xf32>
    %c0_17 = arith.constant 0 : index
    %c0_18 = arith.constant 0 : index
    %c0_19 = arith.constant 0 : index
    %31 = vector.load %arg6[%c0_17, %c0_18, %c0_19] : memref<3x36x36xf32, #tpu.memory_space<vmem>>, vector<1x36x36xf32>
    %32 = vector.shape_cast %31 : vector<1x36x36xf32> to vector<36x36xf32>
    %cst_20 = arith.constant dense<0.000000e+00> : vector<16x36xf32>
    %33 = tpu.matmul %0, %32, %cst_20 {dimension_numbers = #tpu.dot_dimension_numbers<[1], [0], [0], [1], [0, 0, 1, 1], [], []>} : vector<16x36xf32>, vector<36x36xf32>, vector<16x36xf32> -> vector<16x36xf32>
    %c0_21 = arith.constant 0 : index
    %c0_22 = arith.constant 0 : index
    %c0_23 = arith.constant 0 : index
    %34 = vector.load %arg7[%c0_21, %c0_22, %c0_23] : memref<3x1x36xf32, #tpu.memory_space<vmem>>, vector<1x1x36xf32>
    %35 = vector.shape_cast %34 : vector<1x1x36xf32> to vector<1x36xf32>
    %36 = vector.broadcast %35 : vector<1x36xf32> to vector<16x36xf32>
    %37 = arith.addf %33, %36 : vector<16x36xf32>
    %cst_24 = arith.constant 0.000000e+00 : f32
    %38 = vector.broadcast %cst_24 : f32 to vector<16x36xf32>
    %39 = vector.broadcast %9 : vector<1x36xf32> to vector<16x36xf32>
    %40 = arith.mulf %23, %39 : vector<16x36xf32>
    %cst_25 = arith.constant dense<0.000000e+00> : vector<16x16xf32>
    %41 = tpu.matmul %40, %30, %cst_25 {dimension_numbers = #tpu.dot_dimension_numbers<[1], [1], [0], [0], [0, 0, 1, 0], [], []>} : vector<16x36xf32>, vector<16x36xf32>, vector<16x16xf32> -> vector<16x16xf32>
    %cst_26 = arith.constant 0.235702261 : f32
    %42 = vector.broadcast %cst_26 : f32 to vector<16x16xf32>
    %43 = arith.mulf %41, %42 : vector<16x16xf32>
    %44 = arith.addf %43, %1 : vector<16x16xf32>
    %cst_27 = arith.constant dense<0xFF800000> : vector<16xf32>
    %45 = vector.multi_reduction <maximumf>, %44, %cst_27 [1] : vector<16x16xf32> to vector<16xf32>
    %cst_28 = arith.constant 0xFF800000 : f32
    %46 = vector.broadcast %cst_28 : f32 to vector<16xf32>
    %47 = arith.maximumf %46, %45 : vector<16xf32>
    %48 = vector.shape_cast %47 : vector<16xf32> to vector<16x1xf32>
    %49 = vector.broadcast %48 : vector<16x1xf32> to vector<16x16xf32>
    %50 = arith.subf %44, %49 : vector<16x16xf32>
    %51 = math.exp %50 : vector<16x16xf32>
    %cst_29 = arith.constant dense<0.000000e+00> : vector<16xf32>
    %52 = vector.multi_reduction <add>, %51, %cst_29 [1] : vector<16x16xf32> to vector<16xf32>
    %53 = vector.shape_cast %52 : vector<16xf32> to vector<16x1xf32>
    %54 = vector.broadcast %53 : vector<16x1xf32> to vector<16x16xf32>
    %55 = arith.divf %51, %54 : vector<16x16xf32>
    %56 = vector.broadcast %9 : vector<1x36xf32> to vector<16x36xf32>
    %57 = arith.mulf %37, %56 : vector<16x36xf32>
    %cst_30 = arith.constant dense<0.000000e+00> : vector<16x36xf32>
    %58 = tpu.matmul %55, %57, %cst_30 {dimension_numbers = #tpu.dot_dimension_numbers<[1], [0], [0], [1], [0, 0, 1, 1], [], []>} : vector<16x16xf32>, vector<16x36xf32>, vector<16x36xf32> -> vector<16x36xf32>
    %59 = arith.addf %38, %58 : vector<16x36xf32>
    %60 = vector.broadcast %16 : vector<1x36xf32> to vector<16x36xf32>
    %61 = arith.mulf %23, %60 : vector<16x36xf32>
    %cst_31 = arith.constant dense<0.000000e+00> : vector<16x16xf32>
    %62 = tpu.matmul %61, %30, %cst_31 {dimension_numbers = #tpu.dot_dimension_numbers<[1], [1], [0], [0], [0, 0, 1, 0], [], []>} : vector<16x36xf32>, vector<16x36xf32>, vector<16x16xf32> -> vector<16x16xf32>
    %cst_32 = arith.constant 0.235702261 : f32
    %63 = vector.broadcast %cst_32 : f32 to vector<16x16xf32>
    %64 = arith.mulf %62, %63 : vector<16x16xf32>
    %65 = arith.addf %64, %1 : vector<16x16xf32>
    %cst_33 = arith.constant dense<0xFF800000> : vector<16xf32>
    %66 = vector.multi_reduction <maximumf>, %65, %cst_33 [1] : vector<16x16xf32> to vector<16xf32>
    %cst_34 = arith.constant 0xFF800000 : f32
    %67 = vector.broadcast %cst_34 : f32 to vector<16xf32>
    %68 = arith.maximumf %67, %66 : vector<16xf32>
    %69 = vector.shape_cast %68 : vector<16xf32> to vector<16x1xf32>
    %70 = vector.broadcast %69 : vector<16x1xf32> to vector<16x16xf32>
    %71 = arith.subf %65, %70 : vector<16x16xf32>
    %72 = math.exp %71 : vector<16x16xf32>
    %cst_35 = arith.constant dense<0.000000e+00> : vector<16xf32>
    %73 = vector.multi_reduction <add>, %72, %cst_35 [1] : vector<16x16xf32> to vector<16xf32>
    %74 = vector.shape_cast %73 : vector<16xf32> to vector<16x1xf32>
    %75 = vector.broadcast %74 : vector<16x1xf32> to vector<16x16xf32>
    %76 = arith.divf %72, %75 : vector<16x16xf32>
    %77 = vector.broadcast %16 : vector<1x36xf32> to vector<16x36xf32>
    %78 = arith.mulf %37, %77 : vector<16x36xf32>
    %cst_36 = arith.constant dense<0.000000e+00> : vector<16x36xf32>
    %79 = tpu.matmul %76, %78, %cst_36 {dimension_numbers = #tpu.dot_dimension_numbers<[1], [0], [0], [1], [0, 0, 1, 1], [], []>} : vector<16x16xf32>, vector<16x36xf32>, vector<16x36xf32> -> vector<16x36xf32>
    %80 = arith.addf %59, %79 : vector<16x36xf32>
    %c0_37 = arith.constant 0 : index
    %c0_38 = arith.constant 0 : index
    %c0_39 = arith.constant 0 : index
    %81 = vector.load %arg8[%c0_37, %c0_38, %c0_39] : memref<3x36x36xf32, #tpu.memory_space<vmem>>, vector<1x36x36xf32>
    %82 = vector.shape_cast %81 : vector<1x36x36xf32> to vector<36x36xf32>
    %cst_40 = arith.constant dense<0.000000e+00> : vector<16x36xf32>
    %83 = tpu.matmul %80, %82, %cst_40 {dimension_numbers = #tpu.dot_dimension_numbers<[1], [0], [0], [1], [0, 0, 1, 1], [], []>} : vector<16x36xf32>, vector<36x36xf32>, vector<16x36xf32> -> vector<16x36xf32>
    %c0_41 = arith.constant 0 : index
    %c0_42 = arith.constant 0 : index
    %c0_43 = arith.constant 0 : index
    %84 = vector.load %arg9[%c0_41, %c0_42, %c0_43] : memref<3x1x36xf32, #tpu.memory_space<vmem>>, vector<1x1x36xf32>
    %85 = vector.shape_cast %84 : vector<1x1x36xf32> to vector<1x36xf32>
    %86 = vector.broadcast %85 : vector<1x36xf32> to vector<16x36xf32>
    %87 = arith.addf %83, %86 : vector<16x36xf32>
    %88 = arith.addf %0, %87 : vector<16x36xf32>
    %c0_44 = arith.constant 0 : index
    %c0_45 = arith.constant 0 : index
    %c0_46 = arith.constant 0 : index
    %89 = vector.load %arg14[%c0_44, %c0_45, %c0_46] : memref<3x1x36xf32, #tpu.memory_space<vmem>>, vector<1x1x36xf32>
    %90 = vector.shape_cast %89 : vector<1x1x36xf32> to vector<1x36xf32>
    %c0_47 = arith.constant 0 : index
    %c0_48 = arith.constant 0 : index
    %c0_49 = arith.constant 0 : index
    %91 = vector.load %arg15[%c0_47, %c0_48, %c0_49] : memref<3x1x36xf32, #tpu.memory_space<vmem>>, vector<1x1x36xf32>
    %92 = vector.shape_cast %91 : vector<1x1x36xf32> to vector<1x36xf32>
    %cst_50 = arith.constant dense<0.000000e+00> : vector<16xf32>
    %93 = vector.multi_reduction <add>, %88, %cst_50 [1] : vector<16x36xf32> to vector<16xf32>
    %94 = vector.shape_cast %93 : vector<16xf32> to vector<16x1xf32>
    %cst_51 = arith.constant 3.600000e+01 : f32
    %95 = vector.broadcast %cst_51 : f32 to vector<16x1xf32>
    %96 = arith.divf %94, %95 : vector<16x1xf32>
    %97 = vector.broadcast %96 : vector<16x1xf32> to vector<16x36xf32>
    %98 = arith.subf %88, %97 : vector<16x36xf32>
    %99 = arith.mulf %98, %98 : vector<16x36xf32>
    %cst_52 = arith.constant dense<0.000000e+00> : vector<16xf32>
    %100 = vector.multi_reduction <add>, %99, %cst_52 [1] : vector<16x36xf32> to vector<16xf32>
    %101 = vector.shape_cast %100 : vector<16xf32> to vector<16x1xf32>
    %cst_53 = arith.constant 3.600000e+01 : f32
    %102 = vector.broadcast %cst_53 : f32 to vector<16x1xf32>
    %103 = arith.divf %101, %102 : vector<16x1xf32>
    %104 = vector.broadcast %96 : vector<16x1xf32> to vector<16x36xf32>
    %105 = arith.subf %88, %104 : vector<16x36xf32>
    %cst_54 = arith.constant 9.99999974E-6 : f32
    %106 = vector.broadcast %cst_54 : f32 to vector<16x1xf32>
    %107 = arith.addf %103, %106 : vector<16x1xf32>
    %108 = math.rsqrt %107 : vector<16x1xf32>
    %109 = vector.broadcast %108 : vector<16x1xf32> to vector<16x36xf32>
    %110 = arith.mulf %105, %109 : vector<16x36xf32>
    %111 = vector.broadcast %90 : vector<1x36xf32> to vector<16x36xf32>
    %112 = arith.mulf %110, %111 : vector<16x36xf32>
    %113 = vector.broadcast %92 : vector<1x36xf32> to vector<16x36xf32>
    %114 = arith.addf %112, %113 : vector<16x36xf32>
    %c0_55 = arith.constant 0 : index
    %c0_56 = arith.constant 0 : index
    %c0_57 = arith.constant 0 : index
    %115 = vector.load %arg10[%c0_55, %c0_56, %c0_57] : memref<3x36x32xf32, #tpu.memory_space<vmem>>, vector<1x36x32xf32>
    %116 = vector.shape_cast %115 : vector<1x36x32xf32> to vector<36x32xf32>
    %cst_58 = arith.constant dense<0.000000e+00> : vector<16x32xf32>
    %117 = tpu.matmul %114, %116, %cst_58 {dimension_numbers = #tpu.dot_dimension_numbers<[1], [0], [0], [1], [0, 0, 1, 1], [], []>} : vector<16x36xf32>, vector<36x32xf32>, vector<16x32xf32> -> vector<16x32xf32>
    %c0_59 = arith.constant 0 : index
    %c0_60 = arith.constant 0 : index
    %c0_61 = arith.constant 0 : index
    %118 = vector.load %arg11[%c0_59, %c0_60, %c0_61] : memref<3x1x32xf32, #tpu.memory_space<vmem>>, vector<1x1x32xf32>
    %119 = vector.shape_cast %118 : vector<1x1x32xf32> to vector<1x32xf32>
    %120 = vector.broadcast %119 : vector<1x32xf32> to vector<16x32xf32>
    %121 = arith.addf %117, %120 : vector<16x32xf32>
    %cst_62 = arith.constant 0.000000e+00 : f32
    %122 = vector.broadcast %cst_62 : f32 to vector<16x32xf32>
    %123 = arith.maximumf %121, %122 : vector<16x32xf32>
    %c0_63 = arith.constant 0 : index
    %c0_64 = arith.constant 0 : index
    %c0_65 = arith.constant 0 : index
    %124 = vector.load %arg12[%c0_63, %c0_64, %c0_65] : memref<3x32x36xf32, #tpu.memory_space<vmem>>, vector<1x32x36xf32>
    %125 = vector.shape_cast %124 : vector<1x32x36xf32> to vector<32x36xf32>
    %cst_66 = arith.constant dense<0.000000e+00> : vector<16x36xf32>
    %126 = tpu.matmul %123, %125, %cst_66 {dimension_numbers = #tpu.dot_dimension_numbers<[1], [0], [0], [1], [0, 0, 1, 1], [], []>} : vector<16x32xf32>, vector<32x36xf32>, vector<16x36xf32> -> vector<16x36xf32>
    %c0_67 = arith.constant 0 : index
    %c0_68 = arith.constant 0 : index
    %c0_69 = arith.constant 0 : index
    %127 = vector.load %arg13[%c0_67, %c0_68, %c0_69] : memref<3x1x36xf32, #tpu.memory_space<vmem>>, vector<1x1x36xf32>
    %128 = vector.shape_cast %127 : vector<1x1x36xf32> to vector<1x36xf32>
    %129 = vector.broadcast %128 : vector<1x36xf32> to vector<16x36xf32>
    %130 = arith.addf %126, %129 : vector<16x36xf32>
    %131 = arith.addf %114, %130 : vector<16x36xf32>
    %c0_70 = arith.constant 0 : index
    %c0_71 = arith.constant 0 : index
    %c0_72 = arith.constant 0 : index
    %132 = vector.load %arg16[%c0_70, %c0_71, %c0_72] : memref<3x1x36xf32, #tpu.memory_space<vmem>>, vector<1x1x36xf32>
    %133 = vector.shape_cast %132 : vector<1x1x36xf32> to vector<1x36xf32>
    %c0_73 = arith.constant 0 : index
    %c0_74 = arith.constant 0 : index
    %c0_75 = arith.constant 0 : index
    %134 = vector.load %arg17[%c0_73, %c0_74, %c0_75] : memref<3x1x36xf32, #tpu.memory_space<vmem>>, vector<1x1x36xf32>
    %135 = vector.shape_cast %134 : vector<1x1x36xf32> to vector<1x36xf32>
    %cst_76 = arith.constant dense<0.000000e+00> : vector<16xf32>
    %136 = vector.multi_reduction <add>, %131, %cst_76 [1] : vector<16x36xf32> to vector<16xf32>
    %137 = vector.shape_cast %136 : vector<16xf32> to vector<16x1xf32>
    %cst_77 = arith.constant 3.600000e+01 : f32
    %138 = vector.broadcast %cst_77 : f32 to vector<16x1xf32>
    %139 = arith.divf %137, %138 : vector<16x1xf32>
    %140 = vector.broadcast %139 : vector<16x1xf32> to vector<16x36xf32>
    %141 = arith.subf %131, %140 : vector<16x36xf32>
    %142 = arith.mulf %141, %141 : vector<16x36xf32>
    %cst_78 = arith.constant dense<0.000000e+00> : vector<16xf32>
    %143 = vector.multi_reduction <add>, %142, %cst_78 [1] : vector<16x36xf32> to vector<16xf32>
    %144 = vector.shape_cast %143 : vector<16xf32> to vector<16x1xf32>
    %cst_79 = arith.constant 3.600000e+01 : f32
    %145 = vector.broadcast %cst_79 : f32 to vector<16x1xf32>
    %146 = arith.divf %144, %145 : vector<16x1xf32>
    %147 = vector.broadcast %139 : vector<16x1xf32> to vector<16x36xf32>
    %148 = arith.subf %131, %147 : vector<16x36xf32>
    %cst_80 = arith.constant 9.99999974E-6 : f32
    %149 = vector.broadcast %cst_80 : f32 to vector<16x1xf32>
    %150 = arith.addf %146, %149 : vector<16x1xf32>
    %151 = math.rsqrt %150 : vector<16x1xf32>
    %152 = vector.broadcast %151 : vector<16x1xf32> to vector<16x36xf32>
    %153 = arith.mulf %148, %152 : vector<16x36xf32>
    %154 = vector.broadcast %133 : vector<1x36xf32> to vector<16x36xf32>
    %155 = arith.mulf %153, %154 : vector<16x36xf32>
    %156 = vector.broadcast %135 : vector<1x36xf32> to vector<16x36xf32>
    %157 = arith.addf %155, %156 : vector<16x36xf32>
    %c1 = arith.constant 1 : index
    %c0_81 = arith.constant 0 : index
    %c0_82 = arith.constant 0 : index
    %158 = vector.load %arg2[%c1, %c0_81, %c0_82] : memref<3x36x36xf32, #tpu.memory_space<vmem>>, vector<1x36x36xf32>
    %159 = vector.shape_cast %158 : vector<1x36x36xf32> to vector<36x36xf32>
    %cst_83 = arith.constant dense<0.000000e+00> : vector<16x36xf32>
    %160 = tpu.matmul %157, %159, %cst_83 {dimension_numbers = #tpu.dot_dimension_numbers<[1], [0], [0], [1], [0, 0, 1, 1], [], []>} : vector<16x36xf32>, vector<36x36xf32>, vector<16x36xf32> -> vector<16x36xf32>
    %c1_84 = arith.constant 1 : index
    %c0_85 = arith.constant 0 : index
    %c0_86 = arith.constant 0 : index
    %161 = vector.load %arg3[%c1_84, %c0_85, %c0_86] : memref<3x1x36xf32, #tpu.memory_space<vmem>>, vector<1x1x36xf32>
    %162 = vector.shape_cast %161 : vector<1x1x36xf32> to vector<1x36xf32>
    %163 = vector.broadcast %162 : vector<1x36xf32> to vector<16x36xf32>
    %164 = arith.addf %160, %163 : vector<16x36xf32>
    %c1_87 = arith.constant 1 : index
    %c0_88 = arith.constant 0 : index
    %c0_89 = arith.constant 0 : index
    %165 = vector.load %arg4[%c1_87, %c0_88, %c0_89] : memref<3x36x36xf32, #tpu.memory_space<vmem>>, vector<1x36x36xf32>
    %166 = vector.shape_cast %165 : vector<1x36x36xf32> to vector<36x36xf32>
    %cst_90 = arith.constant dense<0.000000e+00> : vector<16x36xf32>
    %167 = tpu.matmul %157, %166, %cst_90 {dimension_numbers = #tpu.dot_dimension_numbers<[1], [0], [0], [1], [0, 0, 1, 1], [], []>} : vector<16x36xf32>, vector<36x36xf32>, vector<16x36xf32> -> vector<16x36xf32>
    %c1_91 = arith.constant 1 : index
    %c0_92 = arith.constant 0 : index
    %c0_93 = arith.constant 0 : index
    %168 = vector.load %arg5[%c1_91, %c0_92, %c0_93] : memref<3x1x36xf32, #tpu.memory_space<vmem>>, vector<1x1x36xf32>
    %169 = vector.shape_cast %168 : vector<1x1x36xf32> to vector<1x36xf32>
    %170 = vector.broadcast %169 : vector<1x36xf32> to vector<16x36xf32>
    %171 = arith.addf %167, %170 : vector<16x36xf32>
    %c1_94 = arith.constant 1 : index
    %c0_95 = arith.constant 0 : index
    %c0_96 = arith.constant 0 : index
    %172 = vector.load %arg6[%c1_94, %c0_95, %c0_96] : memref<3x36x36xf32, #tpu.memory_space<vmem>>, vector<1x36x36xf32>
    %173 = vector.shape_cast %172 : vector<1x36x36xf32> to vector<36x36xf32>
    %cst_97 = arith.constant dense<0.000000e+00> : vector<16x36xf32>
    %174 = tpu.matmul %157, %173, %cst_97 {dimension_numbers = #tpu.dot_dimension_numbers<[1], [0], [0], [1], [0, 0, 1, 1], [], []>} : vector<16x36xf32>, vector<36x36xf32>, vector<16x36xf32> -> vector<16x36xf32>
    %c1_98 = arith.constant 1 : index
    %c0_99 = arith.constant 0 : index
    %c0_100 = arith.constant 0 : index
    %175 = vector.load %arg7[%c1_98, %c0_99, %c0_100] : memref<3x1x36xf32, #tpu.memory_space<vmem>>, vector<1x1x36xf32>
    %176 = vector.shape_cast %175 : vector<1x1x36xf32> to vector<1x36xf32>
    %177 = vector.broadcast %176 : vector<1x36xf32> to vector<16x36xf32>
    %178 = arith.addf %174, %177 : vector<16x36xf32>
    %cst_101 = arith.constant 0.000000e+00 : f32
    %179 = vector.broadcast %cst_101 : f32 to vector<16x36xf32>
    %180 = vector.broadcast %9 : vector<1x36xf32> to vector<16x36xf32>
    %181 = arith.mulf %164, %180 : vector<16x36xf32>
    %cst_102 = arith.constant dense<0.000000e+00> : vector<16x16xf32>
    %182 = tpu.matmul %181, %171, %cst_102 {dimension_numbers = #tpu.dot_dimension_numbers<[1], [1], [0], [0], [0, 0, 1, 0], [], []>} : vector<16x36xf32>, vector<16x36xf32>, vector<16x16xf32> -> vector<16x16xf32>
    %cst_103 = arith.constant 0.235702261 : f32
    %183 = vector.broadcast %cst_103 : f32 to vector<16x16xf32>
    %184 = arith.mulf %182, %183 : vector<16x16xf32>
    %185 = arith.addf %184, %1 : vector<16x16xf32>
    %cst_104 = arith.constant dense<0xFF800000> : vector<16xf32>
    %186 = vector.multi_reduction <maximumf>, %185, %cst_104 [1] : vector<16x16xf32> to vector<16xf32>
    %cst_105 = arith.constant 0xFF800000 : f32
    %187 = vector.broadcast %cst_105 : f32 to vector<16xf32>
    %188 = arith.maximumf %187, %186 : vector<16xf32>
    %189 = vector.shape_cast %188 : vector<16xf32> to vector<16x1xf32>
    %190 = vector.broadcast %189 : vector<16x1xf32> to vector<16x16xf32>
    %191 = arith.subf %185, %190 : vector<16x16xf32>
    %192 = math.exp %191 : vector<16x16xf32>
    %cst_106 = arith.constant dense<0.000000e+00> : vector<16xf32>
    %193 = vector.multi_reduction <add>, %192, %cst_106 [1] : vector<16x16xf32> to vector<16xf32>
    %194 = vector.shape_cast %193 : vector<16xf32> to vector<16x1xf32>
    %195 = vector.broadcast %194 : vector<16x1xf32> to vector<16x16xf32>
    %196 = arith.divf %192, %195 : vector<16x16xf32>
    %197 = vector.broadcast %9 : vector<1x36xf32> to vector<16x36xf32>
    %198 = arith.mulf %178, %197 : vector<16x36xf32>
    %cst_107 = arith.constant dense<0.000000e+00> : vector<16x36xf32>
    %199 = tpu.matmul %196, %198, %cst_107 {dimension_numbers = #tpu.dot_dimension_numbers<[1], [0], [0], [1], [0, 0, 1, 1], [], []>} : vector<16x16xf32>, vector<16x36xf32>, vector<16x36xf32> -> vector<16x36xf32>
    %200 = arith.addf %179, %199 : vector<16x36xf32>
    %201 = vector.broadcast %16 : vector<1x36xf32> to vector<16x36xf32>
    %202 = arith.mulf %164, %201 : vector<16x36xf32>
    %cst_108 = arith.constant dense<0.000000e+00> : vector<16x16xf32>
    %203 = tpu.matmul %202, %171, %cst_108 {dimension_numbers = #tpu.dot_dimension_numbers<[1], [1], [0], [0], [0, 0, 1, 0], [], []>} : vector<16x36xf32>, vector<16x36xf32>, vector<16x16xf32> -> vector<16x16xf32>
    %cst_109 = arith.constant 0.235702261 : f32
    %204 = vector.broadcast %cst_109 : f32 to vector<16x16xf32>
    %205 = arith.mulf %203, %204 : vector<16x16xf32>
    %206 = arith.addf %205, %1 : vector<16x16xf32>
    %cst_110 = arith.constant dense<0xFF800000> : vector<16xf32>
    %207 = vector.multi_reduction <maximumf>, %206, %cst_110 [1] : vector<16x16xf32> to vector<16xf32>
    %cst_111 = arith.constant 0xFF800000 : f32
    %208 = vector.broadcast %cst_111 : f32 to vector<16xf32>
    %209 = arith.maximumf %208, %207 : vector<16xf32>
    %210 = vector.shape_cast %209 : vector<16xf32> to vector<16x1xf32>
    %211 = vector.broadcast %210 : vector<16x1xf32> to vector<16x16xf32>
    %212 = arith.subf %206, %211 : vector<16x16xf32>
    %213 = math.exp %212 : vector<16x16xf32>
    %cst_112 = arith.constant dense<0.000000e+00> : vector<16xf32>
    %214 = vector.multi_reduction <add>, %213, %cst_112 [1] : vector<16x16xf32> to vector<16xf32>
    %215 = vector.shape_cast %214 : vector<16xf32> to vector<16x1xf32>
    %216 = vector.broadcast %215 : vector<16x1xf32> to vector<16x16xf32>
    %217 = arith.divf %213, %216 : vector<16x16xf32>
    %218 = vector.broadcast %16 : vector<1x36xf32> to vector<16x36xf32>
    %219 = arith.mulf %178, %218 : vector<16x36xf32>
    %cst_113 = arith.constant dense<0.000000e+00> : vector<16x36xf32>
    %220 = tpu.matmul %217, %219, %cst_113 {dimension_numbers = #tpu.dot_dimension_numbers<[1], [0], [0], [1], [0, 0, 1, 1], [], []>} : vector<16x16xf32>, vector<16x36xf32>, vector<16x36xf32> -> vector<16x36xf32>
    %221 = arith.addf %200, %220 : vector<16x36xf32>
    %c1_114 = arith.constant 1 : index
    %c0_115 = arith.constant 0 : index
    %c0_116 = arith.constant 0 : index
    %222 = vector.load %arg8[%c1_114, %c0_115, %c0_116] : memref<3x36x36xf32, #tpu.memory_space<vmem>>, vector<1x36x36xf32>
    %223 = vector.shape_cast %222 : vector<1x36x36xf32> to vector<36x36xf32>
    %cst_117 = arith.constant dense<0.000000e+00> : vector<16x36xf32>
    %224 = tpu.matmul %221, %223, %cst_117 {dimension_numbers = #tpu.dot_dimension_numbers<[1], [0], [0], [1], [0, 0, 1, 1], [], []>} : vector<16x36xf32>, vector<36x36xf32>, vector<16x36xf32> -> vector<16x36xf32>
    %c1_118 = arith.constant 1 : index
    %c0_119 = arith.constant 0 : index
    %c0_120 = arith.constant 0 : index
    %225 = vector.load %arg9[%c1_118, %c0_119, %c0_120] : memref<3x1x36xf32, #tpu.memory_space<vmem>>, vector<1x1x36xf32>
    %226 = vector.shape_cast %225 : vector<1x1x36xf32> to vector<1x36xf32>
    %227 = vector.broadcast %226 : vector<1x36xf32> to vector<16x36xf32>
    %228 = arith.addf %224, %227 : vector<16x36xf32>
    %229 = arith.addf %157, %228 : vector<16x36xf32>
    %c1_121 = arith.constant 1 : index
    %c0_122 = arith.constant 0 : index
    %c0_123 = arith.constant 0 : index
    %230 = vector.load %arg14[%c1_121, %c0_122, %c0_123] : memref<3x1x36xf32, #tpu.memory_space<vmem>>, vector<1x1x36xf32>
    %231 = vector.shape_cast %230 : vector<1x1x36xf32> to vector<1x36xf32>
    %c1_124 = arith.constant 1 : index
    %c0_125 = arith.constant 0 : index
    %c0_126 = arith.constant 0 : index
    %232 = vector.load %arg15[%c1_124, %c0_125, %c0_126] : memref<3x1x36xf32, #tpu.memory_space<vmem>>, vector<1x1x36xf32>
    %233 = vector.shape_cast %232 : vector<1x1x36xf32> to vector<1x36xf32>
    %cst_127 = arith.constant dense<0.000000e+00> : vector<16xf32>
    %234 = vector.multi_reduction <add>, %229, %cst_127 [1] : vector<16x36xf32> to vector<16xf32>
    %235 = vector.shape_cast %234 : vector<16xf32> to vector<16x1xf32>
    %cst_128 = arith.constant 3.600000e+01 : f32
    %236 = vector.broadcast %cst_128 : f32 to vector<16x1xf32>
    %237 = arith.divf %235, %236 : vector<16x1xf32>
    %238 = vector.broadcast %237 : vector<16x1xf32> to vector<16x36xf32>
    %239 = arith.subf %229, %238 : vector<16x36xf32>
    %240 = arith.mulf %239, %239 : vector<16x36xf32>
    %cst_129 = arith.constant dense<0.000000e+00> : vector<16xf32>
    %241 = vector.multi_reduction <add>, %240, %cst_129 [1] : vector<16x36xf32> to vector<16xf32>
    %242 = vector.shape_cast %241 : vector<16xf32> to vector<16x1xf32>
    %cst_130 = arith.constant 3.600000e+01 : f32
    %243 = vector.broadcast %cst_130 : f32 to vector<16x1xf32>
    %244 = arith.divf %242, %243 : vector<16x1xf32>
    %245 = vector.broadcast %237 : vector<16x1xf32> to vector<16x36xf32>
    %246 = arith.subf %229, %245 : vector<16x36xf32>
    %cst_131 = arith.constant 9.99999974E-6 : f32
    %247 = vector.broadcast %cst_131 : f32 to vector<16x1xf32>
    %248 = arith.addf %244, %247 : vector<16x1xf32>
    %249 = math.rsqrt %248 : vector<16x1xf32>
    %250 = vector.broadcast %249 : vector<16x1xf32> to vector<16x36xf32>
    %251 = arith.mulf %246, %250 : vector<16x36xf32>
    %252 = vector.broadcast %231 : vector<1x36xf32> to vector<16x36xf32>
    %253 = arith.mulf %251, %252 : vector<16x36xf32>
    %254 = vector.broadcast %233 : vector<1x36xf32> to vector<16x36xf32>
    %255 = arith.addf %253, %254 : vector<16x36xf32>
    %c1_132 = arith.constant 1 : index
    %c0_133 = arith.constant 0 : index
    %c0_134 = arith.constant 0 : index
    %256 = vector.load %arg10[%c1_132, %c0_133, %c0_134] : memref<3x36x32xf32, #tpu.memory_space<vmem>>, vector<1x36x32xf32>
    %257 = vector.shape_cast %256 : vector<1x36x32xf32> to vector<36x32xf32>
    %cst_135 = arith.constant dense<0.000000e+00> : vector<16x32xf32>
    %258 = tpu.matmul %255, %257, %cst_135 {dimension_numbers = #tpu.dot_dimension_numbers<[1], [0], [0], [1], [0, 0, 1, 1], [], []>} : vector<16x36xf32>, vector<36x32xf32>, vector<16x32xf32> -> vector<16x32xf32>
    %c1_136 = arith.constant 1 : index
    %c0_137 = arith.constant 0 : index
    %c0_138 = arith.constant 0 : index
    %259 = vector.load %arg11[%c1_136, %c0_137, %c0_138] : memref<3x1x32xf32, #tpu.memory_space<vmem>>, vector<1x1x32xf32>
    %260 = vector.shape_cast %259 : vector<1x1x32xf32> to vector<1x32xf32>
    %261 = vector.broadcast %260 : vector<1x32xf32> to vector<16x32xf32>
    %262 = arith.addf %258, %261 : vector<16x32xf32>
    %cst_139 = arith.constant 0.000000e+00 : f32
    %263 = vector.broadcast %cst_139 : f32 to vector<16x32xf32>
    %264 = arith.maximumf %262, %263 : vector<16x32xf32>
    %c1_140 = arith.constant 1 : index
    %c0_141 = arith.constant 0 : index
    %c0_142 = arith.constant 0 : index
    %265 = vector.load %arg12[%c1_140, %c0_141, %c0_142] : memref<3x32x36xf32, #tpu.memory_space<vmem>>, vector<1x32x36xf32>
    %266 = vector.shape_cast %265 : vector<1x32x36xf32> to vector<32x36xf32>
    %cst_143 = arith.constant dense<0.000000e+00> : vector<16x36xf32>
    %267 = tpu.matmul %264, %266, %cst_143 {dimension_numbers = #tpu.dot_dimension_numbers<[1], [0], [0], [1], [0, 0, 1, 1], [], []>} : vector<16x32xf32>, vector<32x36xf32>, vector<16x36xf32> -> vector<16x36xf32>
    %c1_144 = arith.constant 1 : index
    %c0_145 = arith.constant 0 : index
    %c0_146 = arith.constant 0 : index
    %268 = vector.load %arg13[%c1_144, %c0_145, %c0_146] : memref<3x1x36xf32, #tpu.memory_space<vmem>>, vector<1x1x36xf32>
    %269 = vector.shape_cast %268 : vector<1x1x36xf32> to vector<1x36xf32>
    %270 = vector.broadcast %269 : vector<1x36xf32> to vector<16x36xf32>
    %271 = arith.addf %267, %270 : vector<16x36xf32>
    %272 = arith.addf %255, %271 : vector<16x36xf32>
    %c1_147 = arith.constant 1 : index
    %c0_148 = arith.constant 0 : index
    %c0_149 = arith.constant 0 : index
    %273 = vector.load %arg16[%c1_147, %c0_148, %c0_149] : memref<3x1x36xf32, #tpu.memory_space<vmem>>, vector<1x1x36xf32>
    %274 = vector.shape_cast %273 : vector<1x1x36xf32> to vector<1x36xf32>
    %c1_150 = arith.constant 1 : index
    %c0_151 = arith.constant 0 : index
    %c0_152 = arith.constant 0 : index
    %275 = vector.load %arg17[%c1_150, %c0_151, %c0_152] : memref<3x1x36xf32, #tpu.memory_space<vmem>>, vector<1x1x36xf32>
    %276 = vector.shape_cast %275 : vector<1x1x36xf32> to vector<1x36xf32>
    %cst_153 = arith.constant dense<0.000000e+00> : vector<16xf32>
    %277 = vector.multi_reduction <add>, %272, %cst_153 [1] : vector<16x36xf32> to vector<16xf32>
    %278 = vector.shape_cast %277 : vector<16xf32> to vector<16x1xf32>
    %cst_154 = arith.constant 3.600000e+01 : f32
    %279 = vector.broadcast %cst_154 : f32 to vector<16x1xf32>
    %280 = arith.divf %278, %279 : vector<16x1xf32>
    %281 = vector.broadcast %280 : vector<16x1xf32> to vector<16x36xf32>
    %282 = arith.subf %272, %281 : vector<16x36xf32>
    %283 = arith.mulf %282, %282 : vector<16x36xf32>
    %cst_155 = arith.constant dense<0.000000e+00> : vector<16xf32>
    %284 = vector.multi_reduction <add>, %283, %cst_155 [1] : vector<16x36xf32> to vector<16xf32>
    %285 = vector.shape_cast %284 : vector<16xf32> to vector<16x1xf32>
    %cst_156 = arith.constant 3.600000e+01 : f32
    %286 = vector.broadcast %cst_156 : f32 to vector<16x1xf32>
    %287 = arith.divf %285, %286 : vector<16x1xf32>
    %288 = vector.broadcast %280 : vector<16x1xf32> to vector<16x36xf32>
    %289 = arith.subf %272, %288 : vector<16x36xf32>
    %cst_157 = arith.constant 9.99999974E-6 : f32
    %290 = vector.broadcast %cst_157 : f32 to vector<16x1xf32>
    %291 = arith.addf %287, %290 : vector<16x1xf32>
    %292 = math.rsqrt %291 : vector<16x1xf32>
    %293 = vector.broadcast %292 : vector<16x1xf32> to vector<16x36xf32>
    %294 = arith.mulf %289, %293 : vector<16x36xf32>
    %295 = vector.broadcast %274 : vector<1x36xf32> to vector<16x36xf32>
    %296 = arith.mulf %294, %295 : vector<16x36xf32>
    %297 = vector.broadcast %276 : vector<1x36xf32> to vector<16x36xf32>
    %298 = arith.addf %296, %297 : vector<16x36xf32>
    %c2 = arith.constant 2 : index
    %c0_158 = arith.constant 0 : index
    %c0_159 = arith.constant 0 : index
    %299 = vector.load %arg2[%c2, %c0_158, %c0_159] : memref<3x36x36xf32, #tpu.memory_space<vmem>>, vector<1x36x36xf32>
    %300 = vector.shape_cast %299 : vector<1x36x36xf32> to vector<36x36xf32>
    %cst_160 = arith.constant dense<0.000000e+00> : vector<16x36xf32>
    %301 = tpu.matmul %298, %300, %cst_160 {dimension_numbers = #tpu.dot_dimension_numbers<[1], [0], [0], [1], [0, 0, 1, 1], [], []>} : vector<16x36xf32>, vector<36x36xf32>, vector<16x36xf32> -> vector<16x36xf32>
    %c2_161 = arith.constant 2 : index
    %c0_162 = arith.constant 0 : index
    %c0_163 = arith.constant 0 : index
    %302 = vector.load %arg3[%c2_161, %c0_162, %c0_163] : memref<3x1x36xf32, #tpu.memory_space<vmem>>, vector<1x1x36xf32>
    %303 = vector.shape_cast %302 : vector<1x1x36xf32> to vector<1x36xf32>
    %304 = vector.broadcast %303 : vector<1x36xf32> to vector<16x36xf32>
    %305 = arith.addf %301, %304 : vector<16x36xf32>
    %c2_164 = arith.constant 2 : index
    %c0_165 = arith.constant 0 : index
    %c0_166 = arith.constant 0 : index
    %306 = vector.load %arg4[%c2_164, %c0_165, %c0_166] : memref<3x36x36xf32, #tpu.memory_space<vmem>>, vector<1x36x36xf32>
    %307 = vector.shape_cast %306 : vector<1x36x36xf32> to vector<36x36xf32>
    %cst_167 = arith.constant dense<0.000000e+00> : vector<16x36xf32>
    %308 = tpu.matmul %298, %307, %cst_167 {dimension_numbers = #tpu.dot_dimension_numbers<[1], [0], [0], [1], [0, 0, 1, 1], [], []>} : vector<16x36xf32>, vector<36x36xf32>, vector<16x36xf32> -> vector<16x36xf32>
    %c2_168 = arith.constant 2 : index
    %c0_169 = arith.constant 0 : index
    %c0_170 = arith.constant 0 : index
    %309 = vector.load %arg5[%c2_168, %c0_169, %c0_170] : memref<3x1x36xf32, #tpu.memory_space<vmem>>, vector<1x1x36xf32>
    %310 = vector.shape_cast %309 : vector<1x1x36xf32> to vector<1x36xf32>
    %311 = vector.broadcast %310 : vector<1x36xf32> to vector<16x36xf32>
    %312 = arith.addf %308, %311 : vector<16x36xf32>
    %c2_171 = arith.constant 2 : index
    %c0_172 = arith.constant 0 : index
    %c0_173 = arith.constant 0 : index
    %313 = vector.load %arg6[%c2_171, %c0_172, %c0_173] : memref<3x36x36xf32, #tpu.memory_space<vmem>>, vector<1x36x36xf32>
    %314 = vector.shape_cast %313 : vector<1x36x36xf32> to vector<36x36xf32>
    %cst_174 = arith.constant dense<0.000000e+00> : vector<16x36xf32>
    %315 = tpu.matmul %298, %314, %cst_174 {dimension_numbers = #tpu.dot_dimension_numbers<[1], [0], [0], [1], [0, 0, 1, 1], [], []>} : vector<16x36xf32>, vector<36x36xf32>, vector<16x36xf32> -> vector<16x36xf32>
    %c2_175 = arith.constant 2 : index
    %c0_176 = arith.constant 0 : index
    %c0_177 = arith.constant 0 : index
    %316 = vector.load %arg7[%c2_175, %c0_176, %c0_177] : memref<3x1x36xf32, #tpu.memory_space<vmem>>, vector<1x1x36xf32>
    %317 = vector.shape_cast %316 : vector<1x1x36xf32> to vector<1x36xf32>
    %318 = vector.broadcast %317 : vector<1x36xf32> to vector<16x36xf32>
    %319 = arith.addf %315, %318 : vector<16x36xf32>
    %cst_178 = arith.constant 0.000000e+00 : f32
    %320 = vector.broadcast %cst_178 : f32 to vector<16x36xf32>
    %321 = vector.broadcast %9 : vector<1x36xf32> to vector<16x36xf32>
    %322 = arith.mulf %305, %321 : vector<16x36xf32>
    %cst_179 = arith.constant dense<0.000000e+00> : vector<16x16xf32>
    %323 = tpu.matmul %322, %312, %cst_179 {dimension_numbers = #tpu.dot_dimension_numbers<[1], [1], [0], [0], [0, 0, 1, 0], [], []>} : vector<16x36xf32>, vector<16x36xf32>, vector<16x16xf32> -> vector<16x16xf32>
    %cst_180 = arith.constant 0.235702261 : f32
    %324 = vector.broadcast %cst_180 : f32 to vector<16x16xf32>
    %325 = arith.mulf %323, %324 : vector<16x16xf32>
    %326 = arith.addf %325, %1 : vector<16x16xf32>
    %cst_181 = arith.constant dense<0xFF800000> : vector<16xf32>
    %327 = vector.multi_reduction <maximumf>, %326, %cst_181 [1] : vector<16x16xf32> to vector<16xf32>
    %cst_182 = arith.constant 0xFF800000 : f32
    %328 = vector.broadcast %cst_182 : f32 to vector<16xf32>
    %329 = arith.maximumf %328, %327 : vector<16xf32>
    %330 = vector.shape_cast %329 : vector<16xf32> to vector<16x1xf32>
    %331 = vector.broadcast %330 : vector<16x1xf32> to vector<16x16xf32>
    %332 = arith.subf %326, %331 : vector<16x16xf32>
    %333 = math.exp %332 : vector<16x16xf32>
    %cst_183 = arith.constant dense<0.000000e+00> : vector<16xf32>
    %334 = vector.multi_reduction <add>, %333, %cst_183 [1] : vector<16x16xf32> to vector<16xf32>
    %335 = vector.shape_cast %334 : vector<16xf32> to vector<16x1xf32>
    %336 = vector.broadcast %335 : vector<16x1xf32> to vector<16x16xf32>
    %337 = arith.divf %333, %336 : vector<16x16xf32>
    %338 = vector.broadcast %9 : vector<1x36xf32> to vector<16x36xf32>
    %339 = arith.mulf %319, %338 : vector<16x36xf32>
    %cst_184 = arith.constant dense<0.000000e+00> : vector<16x36xf32>
    %340 = tpu.matmul %337, %339, %cst_184 {dimension_numbers = #tpu.dot_dimension_numbers<[1], [0], [0], [1], [0, 0, 1, 1], [], []>} : vector<16x16xf32>, vector<16x36xf32>, vector<16x36xf32> -> vector<16x36xf32>
    %341 = arith.addf %320, %340 : vector<16x36xf32>
    %342 = vector.broadcast %16 : vector<1x36xf32> to vector<16x36xf32>
    %343 = arith.mulf %305, %342 : vector<16x36xf32>
    %cst_185 = arith.constant dense<0.000000e+00> : vector<16x16xf32>
    %344 = tpu.matmul %343, %312, %cst_185 {dimension_numbers = #tpu.dot_dimension_numbers<[1], [1], [0], [0], [0, 0, 1, 0], [], []>} : vector<16x36xf32>, vector<16x36xf32>, vector<16x16xf32> -> vector<16x16xf32>
    %cst_186 = arith.constant 0.235702261 : f32
    %345 = vector.broadcast %cst_186 : f32 to vector<16x16xf32>
    %346 = arith.mulf %344, %345 : vector<16x16xf32>
    %347 = arith.addf %346, %1 : vector<16x16xf32>
    %cst_187 = arith.constant dense<0xFF800000> : vector<16xf32>
    %348 = vector.multi_reduction <maximumf>, %347, %cst_187 [1] : vector<16x16xf32> to vector<16xf32>
    %cst_188 = arith.constant 0xFF800000 : f32
    %349 = vector.broadcast %cst_188 : f32 to vector<16xf32>
    %350 = arith.maximumf %349, %348 : vector<16xf32>
    %351 = vector.shape_cast %350 : vector<16xf32> to vector<16x1xf32>
    %352 = vector.broadcast %351 : vector<16x1xf32> to vector<16x16xf32>
    %353 = arith.subf %347, %352 : vector<16x16xf32>
    %354 = math.exp %353 : vector<16x16xf32>
    %cst_189 = arith.constant dense<0.000000e+00> : vector<16xf32>
    %355 = vector.multi_reduction <add>, %354, %cst_189 [1] : vector<16x16xf32> to vector<16xf32>
    %356 = vector.shape_cast %355 : vector<16xf32> to vector<16x1xf32>
    %357 = vector.broadcast %356 : vector<16x1xf32> to vector<16x16xf32>
    %358 = arith.divf %354, %357 : vector<16x16xf32>
    %359 = vector.broadcast %16 : vector<1x36xf32> to vector<16x36xf32>
    %360 = arith.mulf %319, %359 : vector<16x36xf32>
    %cst_190 = arith.constant dense<0.000000e+00> : vector<16x36xf32>
    %361 = tpu.matmul %358, %360, %cst_190 {dimension_numbers = #tpu.dot_dimension_numbers<[1], [0], [0], [1], [0, 0, 1, 1], [], []>} : vector<16x16xf32>, vector<16x36xf32>, vector<16x36xf32> -> vector<16x36xf32>
    %362 = arith.addf %341, %361 : vector<16x36xf32>
    %c2_191 = arith.constant 2 : index
    %c0_192 = arith.constant 0 : index
    %c0_193 = arith.constant 0 : index
    %363 = vector.load %arg8[%c2_191, %c0_192, %c0_193] : memref<3x36x36xf32, #tpu.memory_space<vmem>>, vector<1x36x36xf32>
    %364 = vector.shape_cast %363 : vector<1x36x36xf32> to vector<36x36xf32>
    %cst_194 = arith.constant dense<0.000000e+00> : vector<16x36xf32>
    %365 = tpu.matmul %362, %364, %cst_194 {dimension_numbers = #tpu.dot_dimension_numbers<[1], [0], [0], [1], [0, 0, 1, 1], [], []>} : vector<16x36xf32>, vector<36x36xf32>, vector<16x36xf32> -> vector<16x36xf32>
    %c2_195 = arith.constant 2 : index
    %c0_196 = arith.constant 0 : index
    %c0_197 = arith.constant 0 : index
    %366 = vector.load %arg9[%c2_195, %c0_196, %c0_197] : memref<3x1x36xf32, #tpu.memory_space<vmem>>, vector<1x1x36xf32>
    %367 = vector.shape_cast %366 : vector<1x1x36xf32> to vector<1x36xf32>
    %368 = vector.broadcast %367 : vector<1x36xf32> to vector<16x36xf32>
    %369 = arith.addf %365, %368 : vector<16x36xf32>
    %370 = arith.addf %298, %369 : vector<16x36xf32>
    %c2_198 = arith.constant 2 : index
    %c0_199 = arith.constant 0 : index
    %c0_200 = arith.constant 0 : index
    %371 = vector.load %arg14[%c2_198, %c0_199, %c0_200] : memref<3x1x36xf32, #tpu.memory_space<vmem>>, vector<1x1x36xf32>
    %372 = vector.shape_cast %371 : vector<1x1x36xf32> to vector<1x36xf32>
    %c2_201 = arith.constant 2 : index
    %c0_202 = arith.constant 0 : index
    %c0_203 = arith.constant 0 : index
    %373 = vector.load %arg15[%c2_201, %c0_202, %c0_203] : memref<3x1x36xf32, #tpu.memory_space<vmem>>, vector<1x1x36xf32>
    %374 = vector.shape_cast %373 : vector<1x1x36xf32> to vector<1x36xf32>
    %cst_204 = arith.constant dense<0.000000e+00> : vector<16xf32>
    %375 = vector.multi_reduction <add>, %370, %cst_204 [1] : vector<16x36xf32> to vector<16xf32>
    %376 = vector.shape_cast %375 : vector<16xf32> to vector<16x1xf32>
    %cst_205 = arith.constant 3.600000e+01 : f32
    %377 = vector.broadcast %cst_205 : f32 to vector<16x1xf32>
    %378 = arith.divf %376, %377 : vector<16x1xf32>
    %379 = vector.broadcast %378 : vector<16x1xf32> to vector<16x36xf32>
    %380 = arith.subf %370, %379 : vector<16x36xf32>
    %381 = arith.mulf %380, %380 : vector<16x36xf32>
    %cst_206 = arith.constant dense<0.000000e+00> : vector<16xf32>
    %382 = vector.multi_reduction <add>, %381, %cst_206 [1] : vector<16x36xf32> to vector<16xf32>
    %383 = vector.shape_cast %382 : vector<16xf32> to vector<16x1xf32>
    %cst_207 = arith.constant 3.600000e+01 : f32
    %384 = vector.broadcast %cst_207 : f32 to vector<16x1xf32>
    %385 = arith.divf %383, %384 : vector<16x1xf32>
    %386 = vector.broadcast %378 : vector<16x1xf32> to vector<16x36xf32>
    %387 = arith.subf %370, %386 : vector<16x36xf32>
    %cst_208 = arith.constant 9.99999974E-6 : f32
    %388 = vector.broadcast %cst_208 : f32 to vector<16x1xf32>
    %389 = arith.addf %385, %388 : vector<16x1xf32>
    %390 = math.rsqrt %389 : vector<16x1xf32>
    %391 = vector.broadcast %390 : vector<16x1xf32> to vector<16x36xf32>
    %392 = arith.mulf %387, %391 : vector<16x36xf32>
    %393 = vector.broadcast %372 : vector<1x36xf32> to vector<16x36xf32>
    %394 = arith.mulf %392, %393 : vector<16x36xf32>
    %395 = vector.broadcast %374 : vector<1x36xf32> to vector<16x36xf32>
    %396 = arith.addf %394, %395 : vector<16x36xf32>
    %c2_209 = arith.constant 2 : index
    %c0_210 = arith.constant 0 : index
    %c0_211 = arith.constant 0 : index
    %397 = vector.load %arg10[%c2_209, %c0_210, %c0_211] : memref<3x36x32xf32, #tpu.memory_space<vmem>>, vector<1x36x32xf32>
    %398 = vector.shape_cast %397 : vector<1x36x32xf32> to vector<36x32xf32>
    %cst_212 = arith.constant dense<0.000000e+00> : vector<16x32xf32>
    %399 = tpu.matmul %396, %398, %cst_212 {dimension_numbers = #tpu.dot_dimension_numbers<[1], [0], [0], [1], [0, 0, 1, 1], [], []>} : vector<16x36xf32>, vector<36x32xf32>, vector<16x32xf32> -> vector<16x32xf32>
    %c2_213 = arith.constant 2 : index
    %c0_214 = arith.constant 0 : index
    %c0_215 = arith.constant 0 : index
    %400 = vector.load %arg11[%c2_213, %c0_214, %c0_215] : memref<3x1x32xf32, #tpu.memory_space<vmem>>, vector<1x1x32xf32>
    %401 = vector.shape_cast %400 : vector<1x1x32xf32> to vector<1x32xf32>
    %402 = vector.broadcast %401 : vector<1x32xf32> to vector<16x32xf32>
    %403 = arith.addf %399, %402 : vector<16x32xf32>
    %cst_216 = arith.constant 0.000000e+00 : f32
    %404 = vector.broadcast %cst_216 : f32 to vector<16x32xf32>
    %405 = arith.maximumf %403, %404 : vector<16x32xf32>
    %c2_217 = arith.constant 2 : index
    %c0_218 = arith.constant 0 : index
    %c0_219 = arith.constant 0 : index
    %406 = vector.load %arg12[%c2_217, %c0_218, %c0_219] : memref<3x32x36xf32, #tpu.memory_space<vmem>>, vector<1x32x36xf32>
    %407 = vector.shape_cast %406 : vector<1x32x36xf32> to vector<32x36xf32>
    %cst_220 = arith.constant dense<0.000000e+00> : vector<16x36xf32>
    %408 = tpu.matmul %405, %407, %cst_220 {dimension_numbers = #tpu.dot_dimension_numbers<[1], [0], [0], [1], [0, 0, 1, 1], [], []>} : vector<16x32xf32>, vector<32x36xf32>, vector<16x36xf32> -> vector<16x36xf32>
    %c2_221 = arith.constant 2 : index
    %c0_222 = arith.constant 0 : index
    %c0_223 = arith.constant 0 : index
    %409 = vector.load %arg13[%c2_221, %c0_222, %c0_223] : memref<3x1x36xf32, #tpu.memory_space<vmem>>, vector<1x1x36xf32>
    %410 = vector.shape_cast %409 : vector<1x1x36xf32> to vector<1x36xf32>
    %411 = vector.broadcast %410 : vector<1x36xf32> to vector<16x36xf32>
    %412 = arith.addf %408, %411 : vector<16x36xf32>
    %413 = arith.addf %396, %412 : vector<16x36xf32>
    %c2_224 = arith.constant 2 : index
    %c0_225 = arith.constant 0 : index
    %c0_226 = arith.constant 0 : index
    %414 = vector.load %arg16[%c2_224, %c0_225, %c0_226] : memref<3x1x36xf32, #tpu.memory_space<vmem>>, vector<1x1x36xf32>
    %415 = vector.shape_cast %414 : vector<1x1x36xf32> to vector<1x36xf32>
    %c2_227 = arith.constant 2 : index
    %c0_228 = arith.constant 0 : index
    %c0_229 = arith.constant 0 : index
    %416 = vector.load %arg17[%c2_227, %c0_228, %c0_229] : memref<3x1x36xf32, #tpu.memory_space<vmem>>, vector<1x1x36xf32>
    %417 = vector.shape_cast %416 : vector<1x1x36xf32> to vector<1x36xf32>
    %cst_230 = arith.constant dense<0.000000e+00> : vector<16xf32>
    %418 = vector.multi_reduction <add>, %413, %cst_230 [1] : vector<16x36xf32> to vector<16xf32>
    %419 = vector.shape_cast %418 : vector<16xf32> to vector<16x1xf32>
    %cst_231 = arith.constant 3.600000e+01 : f32
    %420 = vector.broadcast %cst_231 : f32 to vector<16x1xf32>
    %421 = arith.divf %419, %420 : vector<16x1xf32>
    %422 = vector.broadcast %421 : vector<16x1xf32> to vector<16x36xf32>
    %423 = arith.subf %413, %422 : vector<16x36xf32>
    %424 = arith.mulf %423, %423 : vector<16x36xf32>
    %cst_232 = arith.constant dense<0.000000e+00> : vector<16xf32>
    %425 = vector.multi_reduction <add>, %424, %cst_232 [1] : vector<16x36xf32> to vector<16xf32>
    %426 = vector.shape_cast %425 : vector<16xf32> to vector<16x1xf32>
    %cst_233 = arith.constant 3.600000e+01 : f32
    %427 = vector.broadcast %cst_233 : f32 to vector<16x1xf32>
    %428 = arith.divf %426, %427 : vector<16x1xf32>
    %429 = vector.broadcast %421 : vector<16x1xf32> to vector<16x36xf32>
    %430 = arith.subf %413, %429 : vector<16x36xf32>
    %cst_234 = arith.constant 9.99999974E-6 : f32
    %431 = vector.broadcast %cst_234 : f32 to vector<16x1xf32>
    %432 = arith.addf %428, %431 : vector<16x1xf32>
    %433 = math.rsqrt %432 : vector<16x1xf32>
    %434 = vector.broadcast %433 : vector<16x1xf32> to vector<16x36xf32>
    %435 = arith.mulf %430, %434 : vector<16x36xf32>
    %436 = vector.broadcast %415 : vector<1x36xf32> to vector<16x36xf32>
    %437 = arith.mulf %435, %436 : vector<16x36xf32>
    %438 = vector.broadcast %417 : vector<1x36xf32> to vector<16x36xf32>
    %439 = arith.addf %437, %438 : vector<16x36xf32>
    %c0_235 = arith.constant 0 : index
    %c0_236 = arith.constant 0 : index
    %440 = vector.load %arg18[%c0_235, %c0_236] : memref<36x128xf32, #tpu.memory_space<vmem>>, vector<36x128xf32>
    %cst_237 = arith.constant dense<0.000000e+00> : vector<16x128xf32>
    %441 = tpu.matmul %439, %440, %cst_237 {dimension_numbers = #tpu.dot_dimension_numbers<[1], [0], [0], [1], [0, 0, 1, 1], [], []>} : vector<16x36xf32>, vector<36x128xf32>, vector<16x128xf32> -> vector<16x128xf32>
    %c0_238 = arith.constant 0 : index
    %c0_239 = arith.constant 0 : index
    %442 = vector.load %arg19[%c0_238, %c0_239] : memref<1x128xf32, #tpu.memory_space<vmem>>, vector<1x128xf32>
    %443 = vector.broadcast %442 : vector<1x128xf32> to vector<16x128xf32>
    %444 = arith.addf %441, %443 : vector<16x128xf32>
    %c0_240 = arith.constant 0 : index
    %c0_241 = arith.constant 0 : index
    %445 = vector.load %arg20[%c0_240, %c0_241] : memref<16x128xf32, #tpu.memory_space<vmem>>, vector<16x128xf32>
    tpu.vector_store %arg20[%c0_240, %c0_241], %444 {strides = array<i32>} : memref<16x128xf32, #tpu.memory_space<vmem>>, vector<16x128xf32>,
    return
  }
}

</mosaic_0001>

<bundles_post_ra>
// kernel: _device_forward.2
= control target key start
LH: loop header
LB: loop body
LE: loop exit
PB: predicated region body
PF: predicated region fallthrough
CT: control target
= control target key end

     0   :  { %17 = vsyncpa [#allocation3], 0  ;;  %s260_s20 = smov [#allocation2]   ;;  %s261_s22 = smov 128   ;;  %s380_s0 = inlined_call_operand.vmem [shape: f32[8,4], index: 0, kind: input, shape index: {}]   ;;  %s381_s1 = inlined_call_operand.vmem [shape: f32[2,8], index: 1, kind: input, shape index: {}]   ;;  %s382_s2 = inlined_call_operand.vmem [shape: f32[4,32], index: 2, kind: input, shape index: {}]   ;;  %s383_s3 = inlined_call_operand.vmem [shape: f32[1,32], index: 3, kind: input, shape index: {}]   ;;  %s384_s4 = inlined_call_operand.vmem [shape: f32[32,32], index: 4, kind: input, shape index: {}]   ;;  %s385_s5 = inlined_call_operand.vmem [shape: f32[1,32], index: 5, kind: input, shape index: {}]   ;;  %s386_s6 = inlined_call_operand.hbm [shape: f32[32,32], index: 6, kind: input, shape index: {}]   ;;  %s387_s7 = inlined_call_operand.vmem [shape: f32[1,32], index: 7, kind: input, shape index: {}]   ;;  %s388_s8 = inlined_call_operand.vmem [shape: f32[32,9], index: 8, kind: input, shape index: {}]   ;;  %s389_s9 = inlined_call_operand.vmem [shape: f32[1,9], index: 9, kind: input, shape index: {}]   ;;  %s390_s10 = inlined_call_operand.vmem [shape: f32[2,32], index: 10, kind: output, shape index: {0}]   ;;  %s391_s11 = inlined_call_operand.vmem [shape: f32[2,9], index: 11, kind: output, shape index: {1}]  }
   0x1   :  { %s34_s19 = sshll.u32 %s386_s6, 4  ;;  %s36_s21 = sshll.u32 %s260_s20, 4  ;;  %s35_s19 = int_to_ptr.hbm [resolvable:$true] %s34_s19  ;;  %s37_s21 = int_to_ptr.vmem [resolvable:$true] %s36_s21 }
   0x2   :  { %s262_s23 = smov 8  }
   0x3   :  { %42 = dma.hbm_to_vmem [thread:$0]  %s35_s19, 512, %s37_s21, [#allocation3], %s261_s22, %s261_s22, %s262_s23  }
   0x4   :  { %258 = dma.done.wait [#allocation3], 512  }
   0x5   :  { %259 = vsyncadd [#allocation3], 4294966784  ;;  %vm63_vm0 = vcmask 1043456   ;;  %vm59_vm1 = vcmask 31744   ;;  %v54_v0 = vld [vmem:[%s382_s2] sm:$0xf] }
   0x6   :  { %v53_v1 = vld [vmem:[%s380_s0] sm:$0xff]  ;;  %v91_v2 = vld [vmem:[%s384_s4 + $0x18] sm:$0xff]  ;;  %221 = vmatpush.msk.msra.mxu0 %vm63_vm0, %v54_v0  ;;  %v90_v3 = vld [vmem:[%s384_s4 + $0x10] sm:$0xff]  ;;  %vm96_vm2 = vcmask 261120   ;;  %vm121_vm3 = vcmask 64512   ;;  %vm145_vm4 = vcmask 254976  }
   0x7   :  { %112 = vmatpush.msra.mxu1 %v91_v2  ;;  %222 = vmatmul.msk.f32.vlgmr.msra.gmra.mxu0 %vm59_vm1, %v53_v1  ;;  %v89_v4 = vld [vmem:[%s384_s4 + $0x8] sm:$0xff]  ;;  %v88_v5 = vld [vmem:[%s384_s4] sm:$0xff]  ;;  %v150_v10 = vld [vmem:[#allocation2 + $0x18] sm:$0xff]  ;;  %vm210_vm5 = vcmask 66560  }
   0x8   :  { %v230_v6 = vld [vmem:[%s383_s3] ss:$0 sm:$0xff]  ;;  %v149_v11 = vld [vmem:[#allocation2 + $0x10] sm:$0xff]  ;;  %170 = vmatpush.msra.mxu3 %v150_v10  ;;  %v148_v12 = vld [vmem:[#allocation2 + $0x8] sm:$0xff] }
   0x9   :  { %113 = vmatpush.msra.mxu1 %v90_v3  ;;  %v231_v13 = vld [vmem:[%s385_s5] ss:$0 sm:$0xff]  ;;  %v182_v18 = vld [vmem:[%s388_s8 + $0x18] sm:$0xff]  ;;  %v181_v19 = vld [vmem:[%s388_s8 + $0x10] sm:$0xff] }
   0xa   :  { %171 = vmatpush.msra.mxu3 %v149_v11  ;;  %v120_v16 = vld [vmem:[%s381_s1] sm:$0x3]  ;;  %202 = vmatpush.msrb.mxu0 %v182_v18  ;;  %v180_v21 = vld [vmem:[%s388_s8 + $0x8] sm:$0xff] }
   0xb   :  { %114 = vmatpush.msra.mxu1 %v89_v4  ;;  %v147_v17 = vld [vmem:[#allocation2] sm:$0xff] }
   0xc   :  { %172 = vmatpush.msra.mxu3 %v148_v12  ;;  %203 = vmatpush.msrb.mxu0 %v181_v19  ;;  %v179_v22 = vld [vmem:[%s388_s8] sm:$0xff] }
   0xd   :  { %115 = vmatpush.msra.mxu1 %v88_v5  ;;  %v232_v23 = vld [vmem:[%s387_s7] ss:$0 sm:$0xff] }
   0xe   :  { %173 = vmatpush.msra.mxu3 %v147_v17  ;;  %204 = vmatpush.msrb.mxu0 %v180_v21  ;;  %v233_v27 = vld [vmem:[%s389_s9] ss:$0 sm:$0xff] }
  0x10   :  { %205 = vmatpush.msrb.mxu0 %v179_v22 }
  0x84   :  { %v84_v7 = vpop.f32.mrf.mxu0 }
  0x85   :  { %v85_v8 = vadd.f32 %v230_v6, %v84_v7 }
  0x87   :  { %v87_v9 = vmax.f32 %v85_v8, 0.0 }
  0x89   :  { %223 = vmatmul.msk.f32.vlgmr.msra.gmra.mxu1 %vm96_vm2, %v87_v9 }
 0x106   :  { %v117_v14 = vpop.f32.mrf.mxu1 }
 0x107   :  { %v118_v15 = vadd.f32 %v231_v13, %v117_v14 }
 0x109   :  { %140 = vmatpush.msra.mxu2 %v118_v15 }
 0x10a   :  { %224 = vmatmul.msk.f32.vlgmr.msra.gmra.mxu2 %vm121_vm3, %v120_v16 }
 0x18d   :  { %v142_v20 = vpop.f32.mrf.mxu2 }
 0x18e   :  { %146 = vst.msk [vmem:[%s390_s10] sm:$0x3] %vm145_vm4, %v142_v20  ;;  %225 = vmatmul.msk.f32.vlgmr.msra.gmra.mxu3 %vm96_vm2, %v142_v20 }
 0x211   :  { %v175_v24 = vpop.f32.mrf.mxu3 }
 0x212   :  { %v176_v25 = vadd.f32 %v232_v23, %v175_v24 }
 0x214   :  { %v178_v26 = vmax.f32 %v176_v25, 0.0 }
 0x216   :  { %226 = vmatmul.msk.f32.vlgmr.msrb.gmra.mxu0 %vm96_vm2, %v178_v26 }
 0x293   :  { %v207_v28 = vpop.f32.mrf.mxu0 }
 0x294   :  { %v208_v29 = vadd.f32 %v233_v27, %v207_v28 }
 0x296   :  { %211 = vst.msk [vmem:[%s391_s11] sm:$0x3] %vm210_vm5, %v208_v29 }
 0x297   :  { %220 = vsyncpa [#allocation3], 1 }

// kernel: _device_forward.3
= control target key start
LH: loop header
LB: loop body
LE: loop exit
PB: predicated region body
PF: predicated region fallthrough
CT: control target
= control target key end

     0   :  { %s3001_s0 = inlined_call_operand.vmem [shape: f32[16,36], index: 0, kind: input, shape index: {}]   ;;  %s3002_s1 = inlined_call_operand.vmem [shape: f32[16,16], index: 1, kind: input, shape index: {}]   ;;  %s3003_s2 = inlined_call_operand.vmem [shape: f32[3,36,36], index: 2, kind: input, shape index: {}]   ;;  %s3004_s3 = inlined_call_operand.vmem [shape: f32[3,1,36], index: 3, kind: input, shape index: {}]   ;;  %s3005_s4 = inlined_call_operand.vmem [shape: f32[3,36,36], index: 4, kind: input, shape index: {}]   ;;  %s3006_s5 = inlined_call_operand.vmem [shape: f32[3,1,36], index: 5, kind: input, shape index: {}]   ;;  %s3007_s6 = inlined_call_operand.vmem [shape: f32[3,36,36], index: 6, kind: input, shape index: {}]   ;;  %s3008_s7 = inlined_call_operand.vmem [shape: f32[3,1,36], index: 7, kind: input, shape index: {}]   ;;  %s3009_s8 = inlined_call_operand.vmem [shape: f32[3,36,36], index: 8, kind: input, shape index: {}]   ;;  %s3010_s9 = inlined_call_operand.vmem [shape: f32[3,1,36], index: 9, kind: input, shape index: {}]   ;;  %s3011_s10 = inlined_call_operand.vmem [shape: f32[3,36,32], index: 10, kind: input, shape index: {}]   ;;  %s3012_s11 = inlined_call_operand.vmem [shape: f32[3,1,32], index: 11, kind: input, shape index: {}]   ;;  %s3013_s12 = inlined_call_operand.hbm [shape: f32[3,32,36], index: 12, kind: input, shape index: {}]   ;;  %s3014_s13 = inlined_call_operand.vmem [shape: f32[3,1,36], index: 13, kind: input, shape index: {}]   ;;  %s3015_s14 = inlined_call_operand.vmem [shape: f32[3,1,36], index: 14, kind: input, shape index: {}]   ;;  %s3016_s15 = inlined_call_operand.vmem [shape: f32[3,1,36], index: 15, kind: input, shape index: {}]   ;;  %s3017_s16 = inlined_call_operand.vmem [shape: f32[3,1,36], index: 16, kind: input, shape index: {}]   ;;  %s3018_s17 = inlined_call_operand.vmem [shape: f32[3,1,36], index: 17, kind: input, shape index: {}]   ;;  %s3019_s18 = inlined_call_operand.vmem [shape: f32[36,128], index: 18, kind: input, shape index: {}]   ;;  %s3020_s19 = inlined_call_operand.vmem [shape: f32[1,128], index: 19, kind: input, shape index: {}]   ;;  %s3021_s20 = inlined_call_operand.vmem [shape: f32[16,128], index: 20, kind: output, shape index: {}]  }
   0x1   :  { %3027 = sst [smem:[#allocation5_spill]] %s3001_s0 }
   0x2   :  { %3028 = sst [smem:[#allocation6_spill]] %s3002_s1 }
   0x3   :  { %3029 = sst [smem:[#allocation7_spill]] %s3003_s2 }
   0x4   :  { %3030 = sst [smem:[#allocation8_spill]] %s3004_s3 }
   0x5   :  { %3031 = sst [smem:[#allocation9_spill]] %s3005_s4 }
   0x6   :  { %25 = vsyncpa [#allocation3], 0  ;;  %s54_s23 = sshll.u32 %s3013_s12, 4  ;;  %s2239_s24 = smov [#allocation2]   ;;  %s55_s23 = int_to_ptr.hbm [resolvable:$true] %s54_s23 }
   0x7   :  { %s56_s2 = sshll.u32 %s2239_s24, 4  ;;  %s2240_s25 = smov 128   ;;  %s57_s2 = int_to_ptr.vmem [resolvable:$true] %s56_s2 }
   0x8   :  { %s2241_s3 = smov 8  }
   0x9   :  { %62 = dma.hbm_to_vmem [thread:$0]  %s55_s23, 1536, %s57_s2, [#allocation3], %s2240_s25, %s2240_s25, %s2241_s3  }
   0xa   :  { %2237 = dma.done.wait [#allocation3], 1536  }
   0xb   :  { %2238 = vsyncadd [#allocation3], 4294965760  ;;  %vm113_vm0 = vcmask 1043456   ;;  %s3032_s28 = sld [smem:[#allocation9_spill]]  ;;  %vm106_vm1 = vcmask 293888   ;;  %v85_v13 = vlaneseq  ;;  %v2242_v21 = vmov 0.0  }
   0xc   :  { %s3033_s1 = sld [smem:[#allocation7_spill]]  ;;  %v2106_v17 = vld [vmem:[%s3006_s5] ss:$0 sm:$0xff]  ;;  %v178_v32 = vld [vmem:[%s3007_s6 + $0x18] sm:$0xff]  ;;  %v177_v35 = vld [vmem:[%s3007_s6 + $0x10] sm:$0xff]  ;;  %vm251_vm6 = vcmask 130048  }
   0xd   :  { %s3034_s0 = sld [smem:[#allocation5_spill]]  ;;  %v86_v14 = vand.u32 127, %v85_v13  ;;  %v179_v31 = vld [vmem:[%s3007_s6 + $0x20] sm:$0xf]  ;;  %v176_v37 = vld [vmem:[%s3007_s6 + $0x8] sm:$0xff] }
   0xe   :  { %s3035_s3 = sld [smem:[#allocation8_spill]]  ;;  %1942 = vmatpush.msk.msra.mxu2 %vm113_vm0, %v179_v31  ;;  %v175_v39 = vld [vmem:[%s3007_s6] sm:$0xff] }
   0xf   :  { %vm88_vm2 = vcmp.lt.s32.totalorder %v86_v14, 18  ;;  %vm92_vm3 = vcmp.ge.s32.totalorder %v86_v14, 18  ;;  %vm93_vm4 = vcmp.lt.s32.totalorder %v86_v14, 36  ;;  %s3036_s22 = sld [smem:[#allocation6_spill]]  ;;  %v2108_v13 = vld [vmem:[%s3008_s7] ss:$0 sm:$0xff] }
  0x10   :  { %v2409_v22 = vsel %vm88_vm2, 1.0, %v2242_v21  ;;  %vm94_vm5 = vmand %vm92_vm3, %vm93_vm4  ;;  %199 = vmatpush.msra.mxu2 %v178_v32 }
  0x11   :  { %v144_v0 = vld [vmem:[%s3032_s28 + $0x20] sm:$0xf]  ;;  %v143_v1 = vld [vmem:[%s3032_s28 + $0x18] sm:$0xff]  ;;  %v142_v2 = vld [vmem:[%s3032_s28 + $0x10] sm:$0xff]  ;;  %v2418_v28 = vsel %vm94_vm5, 1.0, %v2242_v21 }
  0x12   :  { %1939 = vmatpush.msk.msra.mxu1 %vm113_vm0, %v144_v0  ;;  %v101_v3 = vld [vmem:[%s3033_s1 + $0x20] sm:$0xf]  ;;  %v100_v4 = vld [vmem:[%s3033_s1 + $0x18] sm:$0xff]  ;;  %v141_v5 = vld [vmem:[%s3032_s28 + $0x8] sm:$0xff]  ;;  %200 = vmatpush.msra.mxu2 %v177_v35 }
  0x13   :  { %1936 = vmatpush.msk.msra.mxu0 %vm113_vm0, %v101_v3  ;;  %v99_v6 = vld [vmem:[%s3033_s1 + $0x10] sm:$0xff]  ;;  %v140_v7 = vld [vmem:[%s3032_s28] sm:$0xff]  ;;  %v98_v8 = vld [vmem:[%s3033_s1 + $0x8] sm:$0xff] }
  0x14   :  { %164 = vmatpush.msra.mxu1 %v143_v1  ;;  %v2384_v9 = vld [vmem:[%s3034_s0] sm:$0xff]  ;;  %v2396_v11 = vld [vmem:[%s3034_s0 + $0x8] sm:$0xff]  ;;  %201 = vmatpush.msra.mxu2 %v176_v37 }
  0x15   :  { %129 = vmatpush.msra.mxu0 %v100_v4  ;;  %v97_v10 = vld [vmem:[%s3033_s1] sm:$0xff]  ;;  %v2450_v42 = vld [vmem:[%s3036_s22 + $0x8] sm:$0xff] }
  0x16   :  { %165 = vmatpush.msra.mxu1 %v142_v2  ;;  %v2107_v16 = vld [vmem:[%s3035_s3] ss:$0 sm:$0xff]  ;;  %202 = vmatpush.msra.mxu2 %v175_v39 }
  0x17   :  { %130 = vmatpush.msra.mxu0 %v99_v6  ;;  %v2434_v34 = vld [vmem:[%s3036_s22] sm:$0xff]  ;;  %1943 = vmatmul.msk.f32.vlgmr.msra.gmra.mxu2 %vm106_vm1, %v2384_v9 }
  0x18   :  { %166 = vmatpush.msra.mxu1 %v141_v5 }
  0x19   :  { %131 = vmatpush.msra.mxu0 %v98_v8 }
  0x1a   :  { %167 = vmatpush.msra.mxu1 %v140_v7 }
  0x1b   :  { %1940 = vmatmul.msk.f32.vlgmr.msra.gmra.mxu1 %vm106_vm1, %v2384_v9  ;;  %132 = vmatpush.msra.mxu0 %v97_v10 }
  0x1c   :  { %1937 = vmatmul.msk.f32.vlgmr.msra.gmra.mxu0 %vm106_vm1, %v2384_v9 }
  0x1f   :  { %1944 = vmatmul.msk.f32.gmra.mxu2 %vm106_vm1, %v2396_v11 }
  0x23   :  { %1941 = vmatmul.msk.f32.gmra.mxu1 %vm106_vm1, %v2396_v11 }
  0x24   :  { %1938 = vmatmul.msk.f32.gmra.mxu0 %vm106_vm1, %v2396_v11 }
  0x98   :  { %v169_v12 = vpop.f32.mrf.mxu1 }
  0x99   :  { %v134_v15 = vpop.f32.mrf.mxu0  ;;  %v170_v23 = vadd.f32 %v2106_v17, %v169_v12 }
  0x9a   :  { %v135_v20 = vadd.f32 %v2107_v16, %v134_v15  ;;  %v204_v12 = vpop.f32.mrf.mxu2 }
  0x9c   :  { %v210_v24 = vmul.f32 %v2409_v22, %v135_v20  ;;  %v302_v29 = vmul.f32 %v2418_v28, %v135_v20 }
  0xa0   :  { %v172_v18 = vpop.f32.mrf.mxu1 }
  0xa1   :  { %v173_v19 = vadd.f32 %v2106_v17, %v172_v18  ;;  %v137_v25 = vpop.f32.mrf.mxu0 }
  0xa2   :  { %v138_v26 = vadd.f32 %v2107_v16, %v137_v25  ;;  %v207_v14 = vpop.f32.mrf.mxu2  ;;  %v205_v16 = vadd.f32 %v2108_v13, %v204_v12 }
  0xa3   :  { %1945 = vmatpush.xpose.msk.msra.mxu3 %vm106_vm1, %v173_v19  ;;  %v208_v15 = vadd.f32 %v2108_v13, %v207_v14  ;;  %v448_v13 = vld [vmem:[%s3009_s8 + $0x18] sm:$0xff]  ;;  %v447_v14 = vld [vmem:[%s3009_s8 + $0x10] sm:$0xff] }
  0xa4   :  { %v211_v27 = vmul.f32 %v2409_v22, %v138_v26  ;;  %v303_v30 = vmul.f32 %v2418_v28, %v138_v26  ;;  %v300_v18 = vmul.f32 %v2409_v22, %v205_v16  ;;  %v385_v20 = vmul.f32 %v2418_v28, %v205_v16 }
  0xa5   :  { %v301_v17 = vmul.f32 %v2409_v22, %v208_v15 }
  0xa7   :  { %1946 = vmatpush.xpose.msk.msra.mxu3 %vm106_vm1, %v170_v23  ;;  %436 = vmatpush.msrb.mxu1 %v301_v17 }
  0xa9   :  { %437 = vmatpush.msrb.mxu1 %v300_v18 }
  0xaa   :  { %1947 = vmatmul.msk.f32.vlgmr.msra.gmra.mxu3 %vm106_vm1, %v210_v24 }
  0xab   :  { %1949 = vmatpush.xpose.msk.msrb.mxu3 %vm106_vm1, %v173_v19  ;;  %v386_v19 = vmul.f32 %v2418_v28, %v208_v15  ;;  %v445_v15 = vld [vmem:[%s3009_s8] sm:$0xff] }
  0xad   :  { %407 = vmatpush.msrb.mxu0 %v386_v19 }
  0xaf   :  { %1950 = vmatpush.xpose.msk.msrb.mxu3 %vm106_vm1, %v170_v23  ;;  %408 = vmatpush.msrb.mxu0 %v385_v20 }
  0xb2   :  { %1948 = vmatmul.msk.f32.gmra.mxu3 %vm106_vm1, %v211_v27 }
  0xba   :  { %1951 = vmatmul.msk.f32.vlgmr.msrb.gmra.mxu3 %vm106_vm1, %v302_v29 }
  0xc2   :  { %1952 = vmatmul.msk.f32.gmra.mxu3 %vm106_vm1, %v303_v30 }
 0x12d   :  { %v241_v33 = vpop.f32.mrf.mxu3 }
 0x12e   :  { %v247_v36 = vmul.f32 0.23570226, %v241_v33 }
 0x130   :  { %v249_v38 = vadd.f32 %v247_v36, %v2434_v34 }
 0x132   :  { %v252_v40 = vsel %vm251_vm6, %v249_v38, -inf }
 0x133   :  { %253 = vmax.xlane.f32.xlu0 %v252_v40 }
 0x135   :  { %v244_v41 = vpop.f32.mrf.mxu3 }
 0x136   :  { %v248_v43 = vmul.f32 0.23570226, %v244_v41 }
 0x138   :  { %v250_v44 = vadd.f32 %v248_v43, %v2450_v42 }
 0x13a   :  { %v255_v45 = vsel %vm251_vm6, %v250_v44, -inf }
 0x13b   :  { %256 = vmax.xlane.f32.xlu1 %v255_v45 }
 0x13d   :  { %v327_v46 = vpop.f32.mrf.mxu3 }
 0x13e   :  { %v333_v47 = vmul.f32 0.23570226, %v327_v46 }
 0x140   :  { %v335_v48 = vadd.f32 %v333_v47, %v2434_v34 }
 0x142   :  { %v337_v49 = vsel %vm251_vm6, %v335_v48, -inf }
 0x143   :  { %338 = vmax.xlane.f32.xlu0 %v337_v49 }
 0x145   :  { %v330_v50 = vpop.f32.mrf.mxu3 }
 0x146   :  { %v334_v51 = vmul.f32 0.23570226, %v330_v50 }
 0x148   :  { %v336_v52 = vadd.f32 %v334_v51, %v2450_v42 }
 0x14a   :  { %v340_v53 = vsel %vm251_vm6, %v336_v52, -inf }
 0x14b   :  { %341 = vmax.xlane.f32.xlu1 %v340_v53 }
 0x1a6   :  { %v254_v54 = vpop.xlane.xlu0 %253 }
 0x1a7   :  { %v258_v55 = vsub.f32 %v249_v38, %v254_v54 }
 0x1a9   :  { %v260_v56 = vmul.f32 1.442695, %v258_v55 }
 0x1ab   :  { %2137 = vpow2.f32 %v260_v56 }
 0x1ae   :  { %v257_v57 = vpop.xlane.xlu1 %256 }
 0x1af   :  { %v259_v58 = vsub.f32 %v250_v44, %v257_v57 }
 0x1b1   :  { %v2138_v59 = vpop.eup %2137  ;;  %v262_v60 = vmul.f32 1.442695, %v259_v58 }
 0x1b2   :  { %v264_v61 = vsel %vm251_vm6, %v2138_v59, 0.0 }
 0x1b3   :  { %2139 = vpow2.f32 %v262_v60  ;;  %265 = vadd.xlane.f32.xlu2 %v264_v61 }
 0x1b6   :  { %v339_v62 = vpop.xlane.xlu0 %338 }
 0x1b7   :  { %v343_v63 = vsub.f32 %v335_v48, %v339_v62 }
 0x1b9   :  { %v2463_v0 = vpop.eup %2139  ;;  %v345_v1 = vmul.f32 1.442695, %v343_v63 }
 0x1ba   :  { %v267_v2 = vsel %vm251_vm6, %v2463_v0, 0.0 }
 0x1bb   :  { %2141 = vpow2.f32 %v345_v1  ;;  %268 = vadd.xlane.f32.xlu0 %v267_v2 }
 0x1be   :  { %v342_v3 = vpop.xlane.xlu1 %341 }
 0x1bf   :  { %v344_v4 = vsub.f32 %v336_v52, %v342_v3 }
 0x1c1   :  { %v2467_v5 = vpop.eup %2141  ;;  %v347_v6 = vmul.f32 1.442695, %v344_v4 }
 0x1c2   :  { %v349_v7 = vsel %vm251_vm6, %v2467_v5, 0.0 }
 0x1c3   :  { %2143 = vpow2.f32 %v347_v6  ;;  %350 = vadd.xlane.f32.xlu2 %v349_v7 }
 0x1c9   :  { %v2471_v8 = vpop.eup %2143 }
 0x1ca   :  { %v352_v10 = vsel %vm251_vm6, %v2471_v8, 0.0 }
 0x1cb   :  { %353 = vadd.xlane.f32.xlu1 %v352_v10 }
 0x226   :  { %v266_v21 = vpop.xlane.xlu2 %265 }
 0x227   :  { %2145 = vrcp.f32 %v266_v21  ;;  %v281_v29 = vand.u32 2147483648, %v266_v21  ;;  %v279_v30 = vand.u32 2147483647, %v266_v21  ;;  %vm275_vm8 = vweird.f32 %v266_v21 }
 0x229   :  { %v282_v33 = vor.u32 1.1754944e-38, %v281_v29  ;;  %vm280_vm10 = vcmp.eq.f32.partialorder %v279_v30, 8.507059e+37 }
 0x22d   :  { %v2146_v23 = vpop.eup %2145 }
 0x22e   :  { %v271_v24 = vmul.f32 %v2146_v23, %v266_v21  ;;  %v269_v25 = vpop.xlane.xlu0 %268  ;;  %vm276_vm7 = vweird.f32 %v2146_v23 }
 0x22f   :  { %2147 = vrcp.f32 %v269_v25  ;;  %vm277_vm9 = vmor %vm275_vm8, %vm276_vm7  ;;  %v296_v40 = vand.u32 2147483648, %v269_v25  ;;  %v294_v44 = vand.u32 2147483647, %v269_v25  ;;  %vm290_vm12 = vweird.f32 %v269_v25 }
 0x230   :  { %v272_v26 = vsub.f32 1.0, %v271_v24 }
 0x231   :  { %v297_v47 = vor.u32 1.1754944e-38, %v296_v40  ;;  %vm295_vm14 = vcmp.eq.f32.partialorder %v294_v44, 8.507059e+37 }
 0x232   :  { %v273_v27 = vmul.f32 %v2146_v23, %v272_v26 }
 0x234   :  { %v274_v31 = vadd.f32 %v2146_v23, %v273_v27 }
 0x235   :  { %v2148_v32 = vpop.eup %2147 }
 0x236   :  { %v286_v35 = vmul.f32 %v2148_v32, %v269_v25  ;;  %v351_v36 = vpop.xlane.xlu2 %350  ;;  %v278_v37 = vsel %vm277_vm9, %v2146_v23, %v274_v31  ;;  %vm291_vm11 = vweird.f32 %v2148_v32  ;;  %v2109_v23 = vld [vmem:[%s3010_s9] ss:$0 sm:$0xff] }
 0x237   :  { %2149 = vrcp.f32 %v351_v36  ;;  %v283_v39 = vsel %vm280_vm10, %v282_v33, %v278_v37  ;;  %vm292_vm13 = vmor %vm290_vm12, %vm291_vm11  ;;  %v366_v54 = vand.u32 2147483648, %v351_v36  ;;  %v364_v56 = vand.u32 2147483647, %v351_v36 }
 0x238   :  { %v287_v38 = vsub.f32 1.0, %v286_v35  ;;  %v284_v41 = vmul.f32 %v2138_v59, %v283_v39  ;;  %vm360_vm2 = vweird.f32 %v351_v36  ;;  %v2243_v33 = vmov 36.0  }
 0x239   :  { %v367_v59 = vor.u32 1.1754944e-38, %v366_v54  ;;  %vm365_vm4 = vcmp.eq.f32.partialorder %v364_v56, 8.507059e+37  ;;  %v551_v54 = vld [vmem:[%s3011_s10] sm:$0xff] }
 0x23a   :  { %v288_v43 = vmul.f32 %v2148_v32, %v287_v38  ;;  %1955 = vmatmul.msk.f32.vlgmr.msrb.gmra.mxu1 %vm251_vm6, %v284_v41 }
 0x23c   :  { %v289_v45 = vadd.f32 %v2148_v32, %v288_v43 }
 0x23d   :  { %v2150_v46 = vpop.eup %2149 }
 0x23e   :  { %v356_v48 = vmul.f32 %v2150_v46, %v351_v36  ;;  %v354_v49 = vpop.xlane.xlu1 %353  ;;  %v293_v50 = vsel %vm292_vm13, %v2148_v32, %v289_v45  ;;  %vm361_vm15 = vweird.f32 %v2150_v46 }
 0x23f   :  { %2151 = vrcp.f32 %v354_v49  ;;  %v298_v51 = vsel %vm295_vm14, %v297_v47, %v293_v50  ;;  %vm362_vm3 = vmor %vm360_vm2, %vm361_vm15  ;;  %v381_v2 = vand.u32 2147483648, %v354_v49  ;;  %v379_v3 = vand.u32 2147483647, %v354_v49  ;;  %v555_v50 = vld [vmem:[%s3011_s10 + $0x20] sm:$0xf] }
 0x240   :  { %v357_v52 = vsub.f32 1.0, %v356_v48  ;;  %v299_v53 = vmul.f32 %v2463_v0, %v298_v51  ;;  %vm375_vm7 = vweird.f32 %v354_v49  ;;  %2153 = vrcp.f32 %v2243_v33  ;;  %1960 = vmatpush.msk.msra.mxu3 %vm113_vm0, %v555_v50  ;;  %v554_v51 = vld [vmem:[%s3011_s10 + $0x18] sm:$0xff] }
 0x241   :  { %v382_v6 = vor.u32 1.1754944e-38, %v381_v2  ;;  %vm380_vm9 = vcmp.eq.f32.partialorder %v379_v3, 8.507059e+37 }
 0x242   :  { %v358_v55 = vmul.f32 %v2150_v46, %v357_v52  ;;  %1956 = vmatmul.msk.f32.gmra.mxu1 %vm251_vm6, %v299_v53  ;;  %581 = vmatpush.msra.mxu3 %v554_v51  ;;  %v553_v52 = vld [vmem:[%s3011_s10 + $0x10] sm:$0xff]  ;;  %v552_v53 = vld [vmem:[%s3011_s10 + $0x8] sm:$0xff] }
 0x244   :  { %v359_v57 = vadd.f32 %v2150_v46, %v358_v55  ;;  %582 = vmatpush.msra.mxu3 %v553_v52 }
 0x245   :  { %v2152_v58 = vpop.eup %2151 }
 0x246   :  { %v371_v60 = vmul.f32 %v2152_v58, %v354_v49  ;;  %v363_v61 = vsel %vm362_vm3, %v2150_v46, %v359_v57  ;;  %vm376_vm5 = vweird.f32 %v2152_v58  ;;  %v2154_v35 = vpop.eup %2153  ;;  %583 = vmatpush.msra.mxu3 %v552_v53  ;;  %vm602_vm3 = vcmask 261120  }
 0x247   :  { %v368_v62 = vsel %vm365_vm4, %v367_v59, %v363_v61  ;;  %vm377_vm8 = vmor %vm375_vm7, %vm376_vm5  ;;  %v497_v36 = vmul.f32 36.0, %v2154_v35  ;;  %vm501_vm10 = vweird.f32 %v2154_v35 }
 0x248   :  { %v372_v63 = vsub.f32 1.0, %v371_v60  ;;  %v369_v1 = vmul.f32 %v2467_v5, %v368_v62  ;;  %v449_v5 = vld [vmem:[%s3009_s8 + $0x20] sm:$0xf]  ;;  %584 = vmatpush.msra.mxu3 %v551_v54  ;;  %v1969_v54 = vld [vmem:[%s3033_s1 + $0x48] sm:$0xf] }
 0x249   :  { %1957 = vmatpush.msk.msrb.mxu2 %vm113_vm0, %v449_v5  ;;  %v498_v37 = vsub.f32 1.0, %v497_v36  ;;  %1971 = vmatpush.msk.msra.mxu1 %vm113_vm0, %v1969_v54 }
 0x24a   :  { %v373_v0 = vmul.f32 %v2152_v58, %v372_v63  ;;  %1953 = vmatmul.msk.f32.vlgmr.msrb.gmra.mxu0 %vm251_vm6, %v369_v1 }
 0x24b   :  { %475 = vmatpush.msrb.mxu2 %v448_v13  ;;  %v499_v38 = vmul.f32 %v2154_v35, %v498_v37  ;;  %v2111_v13 = vld [vmem:[%s3016_s15] ss:$0 sm:$0xff] }
 0x24c   :  { %v374_v4 = vadd.f32 %v2152_v58, %v373_v0 }
 0x24d   :  { %476 = vmatpush.msrb.mxu2 %v447_v14  ;;  %v500_v39 = vadd.f32 %v2154_v35, %v499_v38 }
 0x24e   :  { %v378_v7 = vsel %vm377_vm8, %v2152_v58, %v374_v4  ;;  %v597_v58 = vld [vmem:[#allocation2 + $0x18] sm:$0xff] }
 0x24f   :  { %v383_v10 = vsel %vm380_vm9, %v382_v6, %v378_v7  ;;  %v2514_v40 = vsel %vm501_vm10, %v2154_v35, %v500_v39  ;;  %621 = vmatpush.msra.mxu0 %v597_v58  ;;  %v2110_v7 = vld [vmem:[%s3015_s14] ss:$0 sm:$0xff] }
 0x250   :  { %v384_v12 = vmul.f32 %v2471_v8, %v383_v10  ;;  %v446_v8 = vld [vmem:[%s3009_s8 + $0x8] sm:$0xff]  ;;  %v2113_v35 = vld [vmem:[%s3014_s13] ss:$0 sm:$0xff] }
 0x251   :  { %477 = vmatpush.msrb.mxu2 %v446_v8  ;;  %v1977_v58 = vld [vmem:[%s3032_s28 + $0x40] sm:$0xff] }
 0x252   :  { %1954 = vmatmul.msk.f32.gmra.mxu0 %vm251_vm6, %v384_v12 }
 0x253   :  { %478 = vmatpush.msrb.mxu2 %v445_v15 }
 0x2b7   :  { %v439_v16 = vpop.f32.mrf.mxu1 }
 0x2bf   :  { %v442_v19 = vpop.f32.mrf.mxu1 }
 0x2c7   :  { %v410_v17 = vpop.f32.mrf.mxu0 }
 0x2c8   :  { %v440_v18 = vadd.f32 %v439_v16, %v410_v17 }
 0x2ca   :  { %1958 = vmatmul.msk.f32.vlgmr.msrb.gmra.mxu2 %vm106_vm1, %v440_v18 }
 0x2cf   :  { %v413_v20 = vpop.f32.mrf.mxu0 }
 0x2d0   :  { %v443_v21 = vadd.f32 %v442_v19, %v413_v20 }
 0x2d2   :  { %1959 = vmatmul.msk.f32.gmra.mxu2 %vm106_vm1, %v443_v21 }
 0x34d   :  { %v480_v24 = vpop.f32.mrf.mxu2 }
 0x34e   :  { %v481_v25 = vadd.f32 %v2109_v23, %v480_v24  ;;  %v595_v24 = vld [vmem:[#allocation2 + $0x8] sm:$0xff] }
 0x350   :  { %v486_v26 = vadd.f32 %v481_v25, %v2384_v9  ;;  %v594_v25 = vld [vmem:[#allocation2] sm:$0xff] }
 0x352   :  { %v490_v27 = vsel %vm106_vm1, %v486_v26, 0.0 }
 0x353   :  { %491 = vadd.xlane.f32.xlu2 %v490_v27 }
 0x355   :  { %v483_v29 = vpop.f32.mrf.mxu2 }
 0x356   :  { %v484_v30 = vadd.f32 %v2109_v23, %v483_v29  ;;  %v596_v23 = vld [vmem:[#allocation2 + $0x10] sm:$0xff] }
 0x357   :  { %622 = vmatpush.msra.mxu0 %v596_v23 }
 0x358   :  { %v487_v31 = vadd.f32 %v484_v30, %v2396_v11 }
 0x359   :  { %623 = vmatpush.msra.mxu0 %v595_v24 }
 0x35a   :  { %v493_v32 = vsel %vm106_vm1, %v487_v31, 0.0 }
 0x35b   :  { %494 = vadd.xlane.f32.xlu0 %v493_v32  ;;  %624 = vmatpush.msra.mxu0 %v594_v25 }
 0x3c6   :  { %v492_v9 = vpop.xlane.xlu2 %491 }
 0x3c7   :  { %v503_v41 = vmul.f32 %v2514_v40, %v492_v9 }
 0x3c9   :  { %v505_v43 = vsub.f32 %v486_v26, %v503_v41  ;;  %v2112_v26 = vld [vmem:[%s3012_s11] ss:$0 sm:$0xff] }
 0x3cb   :  { %v507_v44 = vmul.f32 %v505_v43, %v505_v43 }
 0x3cd   :  { %v509_v11 = vsel %vm106_vm1, %v507_v44, 0.0 }
 0x3ce   :  { %510 = vadd.xlane.f32.xlu1 %v509_v11  ;;  %v495_v45 = vpop.xlane.xlu0 %494 }
 0x3cf   :  { %v504_v46 = vmul.f32 %v2514_v40, %v495_v45 }
 0x3d1   :  { %v506_v47 = vsub.f32 %v487_v31, %v504_v46 }
 0x3d3   :  { %v508_v48 = vmul.f32 %v506_v47, %v506_v47 }
 0x3d5   :  { %v512_v49 = vsel %vm106_vm1, %v508_v48, 0.0 }
 0x3d6   :  { %513 = vadd.xlane.f32.xlu2 %v512_v49 }
 0x441   :  { %v511_v55 = vpop.xlane.xlu1 %510 }
 0x442   :  { %v515_v56 = vmul.f32 %v511_v55, %v2514_v40  ;;  %v1978_v55 = vld [vmem:[%s3032_s28 + $0x48] sm:$0xf] }
 0x443   :  { %1980 = vmatpush.msk.msra.mxu2 %vm113_vm0, %v1978_v55 }
 0x444   :  { %v517_v57 = vadd.f32 1e-05, %v515_v56  ;;  %v1987_v56 = vld [vmem:[%s3007_s6 + $0x48] sm:$0xf] }
 0x445   :  { %1989 = vmatpush.msk.msrb.mxu3 %vm113_vm0, %v1987_v56  ;;  %759 = vmatpush.msra.mxu2 %v1977_v58 }
 0x446   :  { %2155 = vrsqrt.f32 %v517_v57  ;;  %vm525_vm12 = vweird.f32 %v517_v57 }
 0x449   :  { %v514_v59 = vpop.xlane.xlu2 %513 }
 0x44a   :  { %v516_v60 = vmul.f32 %v514_v59, %v2514_v40  ;;  %v1986_v59 = vld [vmem:[%s3007_s6 + $0x40] sm:$0xff] }
 0x44b   :  { %796 = vmatpush.msrb.mxu3 %v1986_v59 }
 0x44c   :  { %v2156_v61 = vpop.eup %2155  ;;  %v518_v62 = vadd.f32 1e-05, %v516_v60  ;;  %v1967_v60 = vld [vmem:[%s3033_s1 + $0x38] sm:$0xff] }
 0x44d   :  { %v520_v63 = vmul.f32 %v2156_v61, %v517_v57  ;;  %vm526_vm11 = vweird.f32 %v2156_v61  ;;  %v1968_v57 = vld [vmem:[%s3033_s1 + $0x40] sm:$0xff] }
 0x44e   :  { %2157 = vrsqrt.f32 %v518_v62  ;;  %vm527_vm13 = vmor %vm525_vm12, %vm526_vm11  ;;  %vm535_vm15 = vweird.f32 %v518_v62  ;;  %722 = vmatpush.msra.mxu1 %v1968_v57 }
 0x44f   :  { %v521_v1 = vmul.f32 %v2156_v61, %v520_v63  ;;  %v1966_v63 = vld [vmem:[%s3033_s1 + $0x30] sm:$0xff] }
 0x450   :  { %723 = vmatpush.msra.mxu1 %v1967_v60 }
 0x451   :  { %v522_v2 = vmul.f32 0.5, %v521_v1  ;;  %v1975_v1 = vld [vmem:[%s3032_s28 + $0x30] sm:$0xff] }
 0x452   :  { %724 = vmatpush.msra.mxu1 %v1966_v63 }
 0x453   :  { %v523_v0 = vsub.f32 1.5, %v522_v2  ;;  %v1984_v2 = vld [vmem:[%s3007_s6 + $0x30] sm:$0xff] }
 0x454   :  { %v2158_v3 = vpop.eup %2157 }
 0x455   :  { %v524_v4 = vmul.f32 %v2156_v61, %v523_v0  ;;  %v530_v6 = vmul.f32 %v2158_v3, %v518_v62  ;;  %vm536_vm14 = vweird.f32 %v2158_v3  ;;  %v1985_v62 = vld [vmem:[%s3007_s6 + $0x38] sm:$0xff]  ;;  %v1965_v0 = vld [vmem:[%s3033_s1 + $0x28] sm:$0xff] }
 0x456   :  { %vm537_vm2 = vmor %vm535_vm15, %vm536_vm14  ;;  %797 = vmatpush.msrb.mxu3 %v1985_v62  ;;  %725 = vmatpush.msra.mxu1 %v1965_v0 }
 0x457   :  { %v528_v10 = vsel %vm527_vm13, %v2156_v61, %v524_v4  ;;  %v531_v12 = vmul.f32 %v2158_v3, %v530_v6  ;;  %v1976_v61 = vld [vmem:[%s3032_s28 + $0x38] sm:$0xff]  ;;  %v1983_v4 = vld [vmem:[%s3007_s6 + $0x28] sm:$0xff] }
 0x458   :  { %v539_v5 = vmul.f32 %v528_v10, %v505_v43  ;;  %760 = vmatpush.msra.mxu2 %v1976_v61  ;;  %798 = vmatpush.msrb.mxu3 %v1984_v2 }
 0x459   :  { %v532_v14 = vmul.f32 0.5, %v531_v12 }
 0x45a   :  { %v544_v8 = vmul.f32 %v2110_v7, %v539_v5  ;;  %761 = vmatpush.msra.mxu2 %v1975_v1  ;;  %799 = vmatpush.msrb.mxu3 %v1983_v4 }
 0x45b   :  { %v533_v15 = vsub.f32 1.5, %v532_v14 }
 0x45c   :  { %v549_v16 = vadd.f32 %v2111_v13, %v544_v8 }
 0x45d   :  { %v534_v17 = vmul.f32 %v2158_v3, %v533_v15 }
 0x45e   :  { %1961 = vmatmul.msk.f32.vlgmr.msra.gmra.mxu3 %vm106_vm1, %v549_v16 }
 0x45f   :  { %v538_v18 = vsel %vm537_vm2, %v2158_v3, %v534_v17  ;;  %v1974_v3 = vld [vmem:[%s3032_s28 + $0x28] sm:$0xff] }
 0x460   :  { %v540_v19 = vmul.f32 %v538_v18, %v506_v47  ;;  %762 = vmatpush.msra.mxu2 %v1974_v3 }
 0x462   :  { %v545_v20 = vmul.f32 %v2110_v7, %v540_v19 }
 0x464   :  { %v550_v21 = vadd.f32 %v2111_v13, %v545_v20 }
 0x466   :  { %1962 = vmatmul.msk.f32.gmra.mxu3 %vm106_vm1, %v550_v21 }
 0x4e1   :  { %v586_v27 = vpop.f32.mrf.mxu3 }
 0x4e2   :  { %v587_v29 = vadd.f32 %v2112_v26, %v586_v27 }
 0x4e4   :  { %v592_v30 = vmax.f32 %v587_v29, 0.0 }
 0x4e6   :  { %1963 = vmatmul.msk.f32.vlgmr.msra.gmra.mxu0 %vm602_vm3, %v592_v30 }
 0x4e9   :  { %v589_v31 = vpop.f32.mrf.mxu3 }
 0x4ea   :  { %v590_v32 = vadd.f32 %v2112_v26, %v589_v31  ;;  %v2115_v26 = vld [vmem:[%s3018_s17] ss:$0 sm:$0xff] }
 0x4ec   :  { %v593_v33 = vmax.f32 %v590_v32, 0.0 }
 0x4ee   :  { %1964 = vmatmul.msk.f32.gmra.mxu0 %vm602_vm3, %v593_v33 }
 0x563   :  { %v626_v36 = vpop.f32.mrf.mxu0 }
 0x564   :  { %v627_v37 = vadd.f32 %v2113_v35, %v626_v36 }
 0x566   :  { %v632_v38 = vadd.f32 %v627_v37, %v549_v16 }
 0x568   :  { %v636_v39 = vsel %vm106_vm1, %v632_v38, 0.0 }
 0x569   :  { %637 = vadd.xlane.f32.xlu0 %v636_v39 }
 0x56b   :  { %v629_v9 = vpop.f32.mrf.mxu0 }
 0x56c   :  { %v630_v41 = vadd.f32 %v2113_v35, %v629_v9  ;;  %v2118_v9 = vld [vmem:[%s3008_s7 + $0x1] ss:$0 sm:$0xff] }
 0x56e   :  { %v633_v43 = vadd.f32 %v630_v41, %v550_v21  ;;  %v2114_v21 = vld [vmem:[%s3017_s16] ss:$0 sm:$0xff] }
 0x570   :  { %v639_v44 = vsel %vm106_vm1, %v633_v43, 0.0 }
 0x571   :  { %640 = vadd.xlane.f32.xlu1 %v639_v44  ;;  %v2116_v44 = vld [vmem:[%s3035_s3 + $0x1] ss:$0 sm:$0xff] }
 0x5dc   :  { %v638_v11 = vpop.xlane.xlu0 %637 }
 0x5dd   :  { %v642_v45 = vmul.f32 %v638_v11, %v2514_v40 }
 0x5df   :  { %v644_v46 = vsub.f32 %v632_v38, %v642_v45 }
 0x5e1   :  { %v646_v47 = vmul.f32 %v644_v46, %v644_v46 }
 0x5e3   :  { %v648_v48 = vsel %vm106_vm1, %v646_v47, 0.0 }
 0x5e4   :  { %v641_v49 = vpop.xlane.xlu1 %640  ;;  %649 = vadd.xlane.f32.xlu2 %v648_v48 }
 0x5e5   :  { %v643_v50 = vmul.f32 %v641_v49, %v2514_v40 }
 0x5e7   :  { %v2559_v51 = vsub.f32 %v633_v43, %v643_v50  ;;  %v2117_v43 = vld [vmem:[%s3006_s5 + $0x1] ss:$0 sm:$0xff] }
 0x5e9   :  { %v647_v52 = vmul.f32 %v2559_v51, %v2559_v51 }
 0x5eb   :  { %v651_v53 = vsel %vm106_vm1, %v647_v52, 0.0 }
 0x5ec   :  { %652 = vadd.xlane.f32.xlu0 %v651_v53 }
 0x657   :  { %v650_v6 = vpop.xlane.xlu2 %649 }
 0x658   :  { %v654_v7 = vmul.f32 %v650_v6, %v2514_v40 }
 0x65a   :  { %v656_v10 = vadd.f32 1e-05, %v654_v7 }
 0x65c   :  { %2159 = vrsqrt.f32 %v656_v10  ;;  %vm664_vm5 = vweird.f32 %v656_v10 }
 0x65f   :  { %v653_v12 = vpop.xlane.xlu0 %652 }
 0x660   :  { %v655_v5 = vmul.f32 %v653_v12, %v2514_v40 }
 0x662   :  { %v2160_v13 = vpop.eup %2159  ;;  %v657_v14 = vadd.f32 1e-05, %v655_v5 }
 0x663   :  { %v659_v8 = vmul.f32 %v2160_v13, %v656_v10  ;;  %vm665_vm4 = vweird.f32 %v2160_v13 }
 0x664   :  { %2161 = vrsqrt.f32 %v657_v14  ;;  %vm666_vm7 = vmor %vm664_vm5, %vm665_vm4  ;;  %vm674_vm9 = vweird.f32 %v657_v14 }
 0x665   :  { %v660_v15 = vmul.f32 %v2160_v13, %v659_v8 }
 0x667   :  { %v661_v16 = vmul.f32 0.5, %v660_v15 }
 0x669   :  { %v662_v17 = vsub.f32 1.5, %v661_v16 }
 0x66a   :  { %v2162_v18 = vpop.eup %2161 }
 0x66b   :  { %v663_v19 = vmul.f32 %v2160_v13, %v662_v17  ;;  %v669_v20 = vmul.f32 %v2162_v18, %v657_v14  ;;  %vm675_vm8 = vweird.f32 %v2162_v18 }
 0x66c   :  { %vm676_vm10 = vmor %vm674_vm9, %vm675_vm8 }
 0x66d   :  { %v667_v23 = vsel %vm666_vm7, %v2160_v13, %v663_v19  ;;  %v670_v24 = vmul.f32 %v2162_v18, %v669_v20 }
 0x66e   :  { %v678_v25 = vmul.f32 %v667_v23, %v644_v46 }
 0x66f   :  { %v671_v27 = vmul.f32 0.5, %v670_v24 }
 0x670   :  { %v683_v29 = vmul.f32 %v2114_v21, %v678_v25 }
 0x671   :  { %v672_v30 = vsub.f32 1.5, %v671_v27 }
 0x672   :  { %v2620_v31 = vadd.f32 %v2115_v26, %v683_v29 }
 0x673   :  { %v673_v32 = vmul.f32 %v2162_v18, %v672_v30 }
 0x674   :  { %1972 = vmatmul.msk.f32.vlgmr.msra.gmra.mxu1 %vm106_vm1, %v2620_v31  ;;  %1981 = vmatmul.msk.f32.vlgmr.msra.gmra.mxu2 %vm106_vm1, %v2620_v31 }
 0x675   :  { %v677_v33 = vsel %vm676_vm10, %v2162_v18, %v673_v32  ;;  %1990 = vmatmul.msk.f32.vlgmr.msrb.gmra.mxu3 %vm106_vm1, %v2620_v31 }
 0x676   :  { %v679_v35 = vmul.f32 %v677_v33, %v2559_v51 }
 0x678   :  { %v684_v36 = vmul.f32 %v2114_v21, %v679_v35 }
 0x67a   :  { %v2629_v37 = vadd.f32 %v2115_v26, %v684_v36 }
 0x67c   :  { %1973 = vmatmul.msk.f32.gmra.mxu1 %vm106_vm1, %v2629_v37  ;;  %1982 = vmatmul.msk.f32.gmra.mxu2 %vm106_vm1, %v2629_v37 }
 0x67d   :  { %1991 = vmatmul.msk.f32.gmra.mxu3 %vm106_vm1, %v2629_v37 }
 0x6f1   :  { %v727_v41 = vpop.f32.mrf.mxu1 }
 0x6f2   :  { %v728_v49 = vadd.f32 %v2116_v44, %v727_v41 }
 0x6f4   :  { %v807_v55 = vmul.f32 %v2409_v22, %v728_v49  ;;  %v898_v56 = vmul.f32 %v2418_v28, %v728_v49 }
 0x6f7   :  { %v764_v38 = vpop.f32.mrf.mxu2 }
 0x6f8   :  { %v801_v39 = vpop.f32.mrf.mxu3  ;;  %v765_v52 = vadd.f32 %v2117_v43, %v764_v38  ;;  %v2008_v38 = vld [vmem:[%s3009_s8 + $0x48] sm:$0xf] }
 0x6f9   :  { %v802_v47 = vadd.f32 %v2118_v9, %v801_v39  ;;  %v730_v57 = vpop.f32.mrf.mxu1  ;;  %v2007_v39 = vld [vmem:[%s3009_s8 + $0x40] sm:$0xff] }
 0x6fa   :  { %v731_v58 = vadd.f32 %v2116_v44, %v730_v57 }
 0x6fb   :  { %v896_v53 = vmul.f32 %v2409_v22, %v802_v47  ;;  %v981_v54 = vmul.f32 %v2418_v28, %v802_v47 }
 0x6fc   :  { %v808_v59 = vmul.f32 %v2409_v22, %v731_v58  ;;  %v899_v60 = vmul.f32 %v2418_v28, %v731_v58 }
 0x6ff   :  { %v767_v11 = vpop.f32.mrf.mxu2 }
 0x700   :  { %v768_v45 = vadd.f32 %v2117_v43, %v767_v11  ;;  %v804_v46 = vpop.f32.mrf.mxu3 }
 0x701   :  { %v805_v48 = vadd.f32 %v2118_v9, %v804_v46  ;;  %v2006_v9 = vld [vmem:[%s3009_s8 + $0x38] sm:$0xff] }
 0x702   :  { %1992 = vmatpush.xpose.msk.msrb.mxu0 %vm106_vm1, %v768_v45  ;;  %1996 = vmatpush.xpose.msk.msrb.mxu1 %vm106_vm1, %v768_v45 }
 0x703   :  { %v897_v50 = vmul.f32 %v2409_v22, %v805_v48  ;;  %v982_v51 = vmul.f32 %v2418_v28, %v805_v48 }
 0x705   :  { %1003 = vmatpush.msrb.mxu2 %v982_v51  ;;  %1032 = vmatpush.msra.mxu3 %v897_v50 }
 0x706   :  { %1993 = vmatpush.xpose.msk.msrb.mxu0 %vm106_vm1, %v765_v52  ;;  %1997 = vmatpush.xpose.msk.msrb.mxu1 %vm106_vm1, %v765_v52 }
 0x707   :  { %1004 = vmatpush.msrb.mxu2 %v981_v54  ;;  %1033 = vmatpush.msra.mxu3 %v896_v53 }
 0x709   :  { %1994 = vmatmul.msk.f32.vlgmr.msrb.gmra.mxu0 %vm106_vm1, %v807_v55  ;;  %1998 = vmatmul.msk.f32.vlgmr.msrb.gmra.mxu1 %vm106_vm1, %v898_v56 }
 0x70a   :  { %2010 = vmatpush.msk.msra.mxu0 %vm113_vm0, %v2008_v38  ;;  %v2119_v38 = vld [vmem:[%s3010_s9 + $0x1] ss:$0 sm:$0xff] }
 0x70c   :  { %1073 = vmatpush.msra.mxu0 %v2007_v39 }
 0x70e   :  { %1074 = vmatpush.msra.mxu0 %v2006_v9 }
 0x711   :  { %1995 = vmatmul.msk.f32.gmra.mxu0 %vm106_vm1, %v808_v59  ;;  %1999 = vmatmul.msk.f32.gmra.mxu1 %vm106_vm1, %v899_v60 }
 0x786   :  { %v838_v61 = vpop.f32.mrf.mxu0  ;;  %v923_v62 = vpop.f32.mrf.mxu1 }
 0x787   :  { %v844_v63 = vmul.f32 0.23570226, %v838_v61  ;;  %v929_v1 = vmul.f32 0.23570226, %v923_v62 }
 0x789   :  { %v846_v2 = vadd.f32 %v844_v63, %v2434_v34  ;;  %v931_v0 = vadd.f32 %v929_v1, %v2434_v34 }
 0x78b   :  { %v848_v3 = vsel %vm251_vm6, %v846_v2, -inf  ;;  %v933_v4 = vsel %vm251_vm6, %v931_v0, -inf }
 0x78c   :  { %849 = vmax.xlane.f32.xlu1 %v848_v3  ;;  %934 = vmax.xlane.f32.xlu2 %v933_v4 }
 0x78e   :  { %v841_v6 = vpop.f32.mrf.mxu0  ;;  %v926_v7 = vpop.f32.mrf.mxu1 }
 0x78f   :  { %v845_v10 = vmul.f32 0.23570226, %v841_v6  ;;  %v930_v12 = vmul.f32 0.23570226, %v926_v7 }
 0x791   :  { %v932_v5 = vadd.f32 %v930_v12, %v2450_v42  ;;  %v847_v13 = vadd.f32 %v845_v10, %v2450_v42 }
 0x793   :  { %v936_v14 = vsel %vm251_vm6, %v932_v5, -inf  ;;  %v851_v8 = vsel %vm251_vm6, %v847_v13, -inf }
 0x794   :  { %937 = vmax.xlane.f32.xlu1 %v936_v14  ;;  %852 = vmax.xlane.f32.xlu0 %v851_v8 }
 0x7ff   :  { %v850_v34 = vpop.xlane.xlu1 %849  ;;  %v935_v15 = vpop.xlane.xlu2 %934 }
 0x800   :  { %v854_v16 = vsub.f32 %v846_v2, %v850_v34  ;;  %v939_v17 = vsub.f32 %v931_v0, %v935_v15 }
 0x802   :  { %v856_v18 = vmul.f32 1.442695, %v854_v16  ;;  %v941_v19 = vmul.f32 1.442695, %v939_v17 }
 0x804   :  { %2163 = vpow2.f32 %v856_v18 }
 0x805   :  { %2165 = vpow2.f32 %v941_v19 }
 0x807   :  { %v938_v20 = vpop.xlane.xlu1 %937  ;;  %v853_v21 = vpop.xlane.xlu0 %852 }
 0x808   :  { %v940_v23 = vsub.f32 %v932_v5, %v938_v20  ;;  %v855_v24 = vsub.f32 %v847_v13, %v853_v21 }
 0x80a   :  { %v2670_v25 = vpop.eup %2163  ;;  %v943_v42 = vmul.f32 1.442695, %v940_v23  ;;  %v858_v26 = vmul.f32 1.442695, %v855_v24 }
 0x80b   :  { %v2672_v27 = vpop.eup %2165  ;;  %v860_v29 = vsel %vm251_vm6, %v2670_v25, 0.0 }
 0x80c   :  { %2167 = vpow2.f32 %v943_v42  ;;  %861 = vadd.xlane.f32.xlu2 %v860_v29  ;;  %v945_v30 = vsel %vm251_vm6, %v2672_v27, 0.0 }
 0x80d   :  { %2169 = vpow2.f32 %v858_v26  ;;  %946 = vadd.xlane.f32.xlu0 %v945_v30  ;;  %v2005_v26 = vld [vmem:[%s3009_s8 + $0x30] sm:$0xff] }
 0x80e   :  { %1075 = vmatpush.msra.mxu0 %v2005_v26  ;;  %v1192_v26 = vld [vmem:[#allocation2 + $0x30] sm:$0xff] }
 0x812   :  { %v2678_v32 = vpop.eup %2167 }
 0x813   :  { %v2680_v33 = vpop.eup %2169  ;;  %v948_v35 = vsel %vm251_vm6, %v2678_v32, 0.0 }
 0x814   :  { %949 = vadd.xlane.f32.xlu2 %v948_v35  ;;  %v863_v36 = vsel %vm251_vm6, %v2680_v33, 0.0 }
 0x815   :  { %864 = vadd.xlane.f32.xlu1 %v863_v36 }
 0x87f   :  { %v862_v41 = vpop.xlane.xlu2 %861 }
 0x880   :  { %2171 = vrcp.f32 %v862_v41  ;;  %v947_v43 = vpop.xlane.xlu0 %946  ;;  %v877_v50 = vand.u32 2147483648, %v862_v41  ;;  %v875_v53 = vand.u32 2147483647, %v862_v41  ;;  %vm871_vm13 = vweird.f32 %v862_v41 }
 0x881   :  { %2173 = vrcp.f32 %v947_v43  ;;  %v962_v54 = vand.u32 2147483648, %v947_v43  ;;  %v960_v56 = vand.u32 2147483647, %v947_v43  ;;  %vm956_vm15 = vweird.f32 %v947_v43 }
 0x882   :  { %v878_v59 = vor.u32 1.1754944e-38, %v877_v50  ;;  %vm876_vm2 = vcmp.eq.f32.partialorder %v875_v53, 8.507059e+37 }
 0x883   :  { %v963_v63 = vor.u32 1.1754944e-38, %v962_v54  ;;  %vm961_vm5 = vcmp.eq.f32.partialorder %v960_v56, 8.507059e+37  ;;  %v2018_v56 = vld [vmem:[%s3011_s10 + $0x40] sm:$0xff] }
 0x886   :  { %v2172_v44 = vpop.eup %2171 }
 0x887   :  { %v2174_v11 = vpop.eup %2173  ;;  %v867_v45 = vmul.f32 %v2172_v44, %v862_v41  ;;  %v950_v46 = vpop.xlane.xlu2 %949  ;;  %vm872_vm11 = vweird.f32 %v2172_v44 }
 0x888   :  { %v952_v47 = vmul.f32 %v2174_v11, %v947_v43  ;;  %2175 = vrcp.f32 %v950_v46  ;;  %v865_v48 = vpop.xlane.xlu1 %864  ;;  %vm957_vm12 = vweird.f32 %v2174_v11  ;;  %vm873_vm14 = vmor %vm871_vm13, %vm872_vm11  ;;  %v977_v10 = vand.u32 2147483648, %v950_v46 }
 0x889   :  { %v868_v49 = vsub.f32 1.0, %v867_v45  ;;  %2177 = vrcp.f32 %v865_v48  ;;  %vm958_vm4 = vmor %vm956_vm15, %vm957_vm12  ;;  %v892_v14 = vand.u32 2147483648, %v865_v48  ;;  %v975_v8 = vand.u32 2147483647, %v950_v46 }
 0x88a   :  { %v953_v51 = vsub.f32 1.0, %v952_v47  ;;  %v890_v15 = vand.u32 2147483647, %v865_v48  ;;  %vm971_vm9 = vweird.f32 %v950_v46  ;;  %v978_v17 = vor.u32 1.1754944e-38, %v977_v10 }
 0x88b   :  { %v869_v52 = vmul.f32 %v2172_v44, %v868_v49  ;;  %vm886_vm10 = vweird.f32 %v865_v48  ;;  %v893_v19 = vor.u32 1.1754944e-38, %v892_v14  ;;  %vm976_vm12 = vcmp.eq.f32.partialorder %v975_v8, 8.507059e+37  ;;  %v2120_v14 = vld [vmem:[%s3015_s14 + $0x1] ss:$0 sm:$0xff] }
 0x88c   :  { %v954_v55 = vmul.f32 %v2174_v11, %v953_v51 }
 0x88d   :  { %v870_v57 = vadd.f32 %v2172_v44, %v869_v52 }
 0x88e   :  { %v2176_v58 = vpop.eup %2175  ;;  %v955_v60 = vadd.f32 %v2174_v11, %v954_v55 }
 0x88f   :  { %v2178_v61 = vpop.eup %2177  ;;  %v874_v62 = vsel %vm873_vm14, %v2172_v44, %v870_v57  ;;  %v967_v1 = vmul.f32 %v2176_v58, %v950_v46  ;;  %vm972_vm7 = vweird.f32 %v2176_v58  ;;  %vm891_vm14 = vcmp.eq.f32.partialorder %v890_v15, 8.507059e+37  ;;  %v2017_v57 = vld [vmem:[%s3011_s10 + $0x38] sm:$0xff] }
 0x890   :  { %v879_v2 = vsel %vm876_vm2, %v878_v59, %v874_v62  ;;  %v959_v0 = vsel %vm958_vm4, %v2174_v11, %v955_v60  ;;  %v882_v3 = vmul.f32 %v2178_v61, %v865_v48  ;;  %vm887_vm8 = vweird.f32 %v2178_v61  ;;  %vm973_vm11 = vmor %vm971_vm9, %vm972_vm7  ;;  %v2015_v59 = vld [vmem:[%s3011_s10 + $0x28] sm:$0xff] }
 0x891   :  { %v964_v4 = vsel %vm961_vm5, %v963_v63, %v959_v0  ;;  %v968_v6 = vsub.f32 1.0, %v967_v1  ;;  %v880_v7 = vmul.f32 %v2670_v25, %v879_v2  ;;  %vm888_vm13 = vmor %vm886_vm10, %vm887_vm8  ;;  %v1193_v63 = vld [vmem:[#allocation2 + $0x38] sm:$0xff] }
 0x892   :  { %v883_v12 = vsub.f32 1.0, %v882_v3  ;;  %v965_v5 = vmul.f32 %v2672_v27, %v964_v4  ;;  %v2004_v27 = vld [vmem:[%s3009_s8 + $0x28] sm:$0xff]  ;;  %1217 = vmatpush.msra.mxu2 %v1193_v63  ;;  %v2031_v63 = vld [vmem:[%s3033_s1 + $0x60] sm:$0xff] }
 0x893   :  { %v969_v13 = vmul.f32 %v2176_v58, %v968_v6  ;;  %2002 = vmatmul.msk.f32.vlgmr.msra.gmra.mxu3 %vm251_vm6, %v880_v7  ;;  %1076 = vmatpush.msra.mxu0 %v2004_v27  ;;  %v1191_v27 = vld [vmem:[#allocation2 + $0x28] sm:$0xff] }
 0x894   :  { %v884_v34 = vmul.f32 %v2178_v61, %v883_v12  ;;  %2000 = vmatmul.msk.f32.vlgmr.msrb.gmra.mxu2 %vm251_vm6, %v965_v5 }
 0x895   :  { %v970_v16 = vadd.f32 %v2176_v58, %v969_v13  ;;  %1218 = vmatpush.msra.mxu2 %v1192_v26 }
 0x896   :  { %v885_v18 = vadd.f32 %v2178_v61, %v884_v34 }
 0x897   :  { %v974_v20 = vsel %vm973_vm11, %v2176_v58, %v970_v16  ;;  %v2016_v58 = vld [vmem:[%s3011_s10 + $0x30] sm:$0xff]  ;;  %v2121_v16 = vld [vmem:[%s3016_s15 + $0x1] ss:$0 sm:$0xff]  ;;  %1219 = vmatpush.msra.mxu2 %v1191_v27 }
 0x898   :  { %v979_v21 = vsel %vm976_vm12, %v978_v17, %v974_v20  ;;  %v889_v23 = vsel %vm888_vm13, %v2178_v61, %v885_v18  ;;  %v2125_v27 = vld [vmem:[%s3018_s17 + $0x1] ss:$0 sm:$0xff] }
 0x899   :  { %v980_v24 = vmul.f32 %v2678_v32, %v979_v21  ;;  %v894_v25 = vsel %vm891_vm14, %v893_v19, %v889_v23 }
 0x89a   :  { %v895_v42 = vmul.f32 %v2680_v33, %v894_v25 }
 0x89c   :  { %2001 = vmatmul.msk.f32.gmra.mxu2 %vm251_vm6, %v980_v24  ;;  %2003 = vmatmul.msk.f32.gmra.mxu3 %vm251_vm6, %v895_v42 }
 0x916   :  { %v1035_v29 = vpop.f32.mrf.mxu3 }
 0x917   :  { %v1006_v30 = vpop.f32.mrf.mxu2 }
 0x918   :  { %v1036_v32 = vadd.f32 %v1035_v29, %v1006_v30  ;;  %v1190_v29 = vld [vmem:[#allocation2 + $0x20] sm:$0xff] }
 0x919   :  { %1220 = vmatpush.msra.mxu2 %v1190_v29  ;;  %v2122_v30 = vld [vmem:[%s3012_s11 + $0x1] ss:$0 sm:$0xff] }
 0x91a   :  { %2011 = vmatmul.msk.f32.vlgmr.msra.gmra.mxu0 %vm106_vm1, %v1036_v32 }
 0x91f   :  { %v1009_v33 = vpop.f32.mrf.mxu2  ;;  %v1038_v35 = vpop.f32.mrf.mxu3 }
 0x920   :  { %v1039_v36 = vadd.f32 %v1038_v35, %v1009_v33 }
 0x922   :  { %2012 = vmatmul.msk.f32.gmra.mxu0 %vm106_vm1, %v1039_v36 }
 0x997   :  { %v1078_v39 = vpop.f32.mrf.mxu0 }
 0x998   :  { %v1079_v9 = vadd.f32 %v2119_v38, %v1078_v39 }
 0x99a   :  { %v1084_v41 = vadd.f32 %v1079_v9, %v2620_v31  ;;  %v2123_v9 = vld [vmem:[%s3014_s13 + $0x1] ss:$0 sm:$0xff] }
 0x99c   :  { %v1090_v43 = vsel %vm106_vm1, %v1084_v41, 0.0 }
 0x99d   :  { %1091 = vadd.xlane.f32.xlu0 %v1090_v43 }
 0x99f   :  { %v1081_v44 = vpop.f32.mrf.mxu0 }
 0x9a0   :  { %v1082_v11 = vadd.f32 %v2119_v38, %v1081_v44 }
 0x9a2   :  { %v1085_v45 = vadd.f32 %v1082_v11, %v2629_v37  ;;  %v2019_v37 = vld [vmem:[%s3011_s10 + $0x48] sm:$0xf] }
 0x9a3   :  { %2021 = vmatpush.msk.msra.mxu1 %vm113_vm0, %v2019_v37 }
 0x9a4   :  { %v1093_v46 = vsel %vm106_vm1, %v1085_v45, 0.0 }
 0x9a5   :  { %1094 = vadd.xlane.f32.xlu1 %v1093_v46  ;;  %1176 = vmatpush.msra.mxu1 %v2018_v56 }
 0x9a7   :  { %1177 = vmatpush.msra.mxu1 %v2017_v57  ;;  %v2033_v57 = vld [vmem:[%s3033_s1 + $0x70] sm:$0xf] }
 0x9a8   :  { %2035 = vmatpush.msk.msrb.mxu3 %vm113_vm0, %v2033_v57 }
 0x9a9   :  { %1178 = vmatpush.msra.mxu1 %v2016_v58  ;;  %v2042_v58 = vld [vmem:[%s3032_s28 + $0x70] sm:$0xf] }
 0x9aa   :  { %2044 = vmatpush.msk.msrb.mxu0 %vm113_vm0, %v2042_v58  ;;  %2096 = vmatpush.msk.msrb.mxu2 %vm113_vm0, %v2042_v58 }
 0x9ab   :  { %1179 = vmatpush.msra.mxu1 %v2015_v59  ;;  %v2051_v59 = vld [vmem:[%s3007_s6 + $0x70] sm:$0xf] }
 0x9ad   :  { %2053 = vmatpush.msk.msrb.mxu1 %vm113_vm0, %v2051_v59 }
 0xa10   :  { %v1092_v47 = vpop.xlane.xlu0 %1091 }
 0xa11   :  { %v1096_v48 = vmul.f32 %v1092_v47, %v2514_v40 }
 0xa13   :  { %v1098_v49 = vsub.f32 %v1084_v41, %v1096_v48 }
 0xa15   :  { %v1100_v50 = vmul.f32 %v1098_v49, %v1098_v49 }
 0xa17   :  { %v1102_v51 = vsel %vm106_vm1, %v1100_v50, 0.0 }
 0xa18   :  { %1103 = vadd.xlane.f32.xlu2 %v1102_v51  ;;  %v1095_v52 = vpop.xlane.xlu1 %1094 }
 0xa19   :  { %v1097_v31 = vmul.f32 %v1095_v52, %v2514_v40 }
 0xa1b   :  { %v1099_v53 = vsub.f32 %v1085_v45, %v1097_v31 }
 0xa1d   :  { %v1101_v54 = vmul.f32 %v1099_v53, %v1099_v53 }
 0xa1f   :  { %v1105_v55 = vsel %vm106_vm1, %v1101_v54, 0.0 }
 0xa20   :  { %1106 = vadd.xlane.f32.xlu0 %v1105_v55 }
 0xa8b   :  { %v1104_v60 = vpop.xlane.xlu2 %1103 }
 0xa8c   :  { %v1108_v61 = vmul.f32 %v1104_v60, %v2514_v40  ;;  %v2032_v60 = vld [vmem:[%s3033_s1 + $0x68] sm:$0xff] }
 0xa8d   :  { %1320 = vmatpush.msrb.mxu3 %v2032_v60 }
 0xa8e   :  { %v1110_v62 = vadd.f32 1e-05, %v1108_v61  ;;  %v2041_v61 = vld [vmem:[%s3032_s28 + $0x68] sm:$0xff] }
 0xa8f   :  { %1357 = vmatpush.msrb.mxu0 %v2041_v61  ;;  %2097 = vmatpush.msrb.mxu2 %v2041_v61 }
 0xa90   :  { %2179 = vrsqrt.f32 %v1110_v62  ;;  %vm1118_vm2 = vweird.f32 %v1110_v62  ;;  %1321 = vmatpush.msrb.mxu3 %v2031_v63 }
 0xa93   :  { %v1107_v1 = vpop.xlane.xlu0 %1106 }
 0xa94   :  { %v1109_v2 = vmul.f32 %v1107_v1, %v2514_v40  ;;  %v2040_v1 = vld [vmem:[%s3032_s28 + $0x60] sm:$0xff] }
 0xa95   :  { %1358 = vmatpush.msrb.mxu0 %v2040_v1  ;;  %2098 = vmatpush.msrb.mxu2 %v2040_v1 }
 0xa96   :  { %v2180_v0 = vpop.eup %2179  ;;  %v1111_v3 = vadd.f32 1e-05, %v1109_v2  ;;  %v2049_v2 = vld [vmem:[%s3007_s6 + $0x60] sm:$0xff] }
 0xa97   :  { %v1113_v4 = vmul.f32 %v2180_v0, %v1110_v62  ;;  %vm1119_vm15 = vweird.f32 %v2180_v0  ;;  %v2050_v62 = vld [vmem:[%s3007_s6 + $0x68] sm:$0xff] }
 0xa98   :  { %2181 = vrsqrt.f32 %v1111_v3  ;;  %vm1120_vm4 = vmor %vm1118_vm2, %vm1119_vm15  ;;  %vm1128_vm7 = vweird.f32 %v1111_v3  ;;  %1394 = vmatpush.msrb.mxu1 %v2050_v62 }
 0xa99   :  { %v1114_v6 = vmul.f32 %v2180_v0, %v1113_v4  ;;  %v2048_v4 = vld [vmem:[%s3007_s6 + $0x58] sm:$0xff] }
 0xa9a   :  { %1395 = vmatpush.msrb.mxu1 %v2049_v2 }
 0xa9b   :  { %v1115_v7 = vmul.f32 0.5, %v1114_v6  ;;  %v2029_v6 = vld [vmem:[%s3033_s1 + $0x50] sm:$0xff] }
 0xa9c   :  { %1396 = vmatpush.msrb.mxu1 %v2048_v4 }
 0xa9d   :  { %v1116_v10 = vsub.f32 1.5, %v1115_v7  ;;  %v2038_v7 = vld [vmem:[%s3032_s28 + $0x50] sm:$0xff] }
 0xa9e   :  { %v2182_v12 = vpop.eup %2181 }
 0xa9f   :  { %v1117_v5 = vmul.f32 %v2180_v0, %v1116_v10  ;;  %v1123_v13 = vmul.f32 %v2182_v12, %v1111_v3  ;;  %vm1129_vm5 = vweird.f32 %v2182_v12  ;;  %v2039_v3 = vld [vmem:[%s3032_s28 + $0x58] sm:$0xff]  ;;  %v2047_v10 = vld [vmem:[%s3007_s6 + $0x50] sm:$0xff] }
 0xaa0   :  { %vm1130_vm8 = vmor %vm1128_vm7, %vm1129_vm5  ;;  %1359 = vmatpush.msrb.mxu0 %v2039_v3  ;;  %2099 = vmatpush.msrb.mxu2 %v2039_v3 }
 0xaa1   :  { %v1121_v8 = vsel %vm1120_vm4, %v2180_v0, %v1117_v5  ;;  %v1124_v34 = vmul.f32 %v2182_v12, %v1123_v13  ;;  %v2030_v0 = vld [vmem:[%s3033_s1 + $0x58] sm:$0xff]  ;;  %1397 = vmatpush.msrb.mxu1 %v2047_v10 }
 0xaa2   :  { %v1132_v15 = vmul.f32 %v1121_v8, %v1098_v49  ;;  %1322 = vmatpush.msrb.mxu3 %v2030_v0  ;;  %1360 = vmatpush.msrb.mxu0 %v2038_v7  ;;  %v2211_v0 = vld [vmem:[%s3036_s22] sm:$0xff] }
 0xaa3   :  { %v1125_v17 = vmul.f32 0.5, %v1124_v34  ;;  %2100 = vmatpush.msrb.mxu2 %v2038_v7 }
 0xaa4   :  { %v1137_v18 = vmul.f32 %v2120_v14, %v1132_v15  ;;  %1323 = vmatpush.msrb.mxu3 %v2029_v6 }
 0xaa5   :  { %v1126_v19 = vsub.f32 1.5, %v1125_v17 }
 0xaa6   :  { %v1142_v20 = vadd.f32 %v2121_v16, %v1137_v18 }
 0xaa7   :  { %v1127_v21 = vmul.f32 %v2182_v12, %v1126_v19 }
 0xaa8   :  { %2022 = vmatmul.msk.f32.vlgmr.msra.gmra.mxu1 %vm106_vm1, %v1142_v20 }
 0xaa9   :  { %v1131_v23 = vsel %vm1130_vm8, %v2182_v12, %v1127_v21 }
 0xaaa   :  { %v1133_v24 = vmul.f32 %v1131_v23, %v1099_v53 }
 0xaac   :  { %v1138_v25 = vmul.f32 %v2120_v14, %v1133_v24  ;;  %v2124_v24 = vld [vmem:[%s3017_s16 + $0x1] ss:$0 sm:$0xff] }
 0xaae   :  { %v1143_v42 = vadd.f32 %v2121_v16, %v1138_v25 }
 0xab0   :  { %2023 = vmatmul.msk.f32.gmra.mxu1 %vm106_vm1, %v1143_v42 }
 0xb25   :  { %v1181_v32 = vpop.f32.mrf.mxu1 }
 0xb26   :  { %v1182_v33 = vadd.f32 %v2122_v30, %v1181_v32 }
 0xb28   :  { %v1187_v35 = vmax.f32 %v1182_v33, 0.0 }
 0xb2a   :  { %2025 = vmatmul.msk.f32.vlgmr.msra.gmra.mxu2 %vm602_vm3, %v1187_v35 }
 0xb2d   :  { %v1184_v36 = vpop.f32.mrf.mxu1 }
 0xb2e   :  { %v1185_v38 = vadd.f32 %v2122_v30, %v1184_v36 }
 0xb30   :  { %v1188_v39 = vmax.f32 %v1185_v38, 0.0 }
 0xb32   :  { %2026 = vmatmul.msk.f32.gmra.mxu2 %vm602_vm3, %v1188_v39 }
 0xbad   :  { %v1222_v41 = vpop.f32.mrf.mxu2 }
 0xbae   :  { %v1223_v43 = vadd.f32 %v2123_v9, %v1222_v41 }
 0xbb0   :  { %v1228_v44 = vadd.f32 %v1223_v43, %v1142_v20  ;;  %v2127_v43 = vld [vmem:[%s3008_s7 + $0x2] ss:$0 sm:$0xff] }
 0xbb2   :  { %v1234_v11 = vsel %vm106_vm1, %v1228_v44, 0.0 }
 0xbb3   :  { %1235 = vadd.xlane.f32.xlu2 %v1234_v11 }
 0xbb5   :  { %v1225_v45 = vpop.f32.mrf.mxu2 }
 0xbb6   :  { %v1226_v46 = vadd.f32 %v2123_v9, %v1225_v45 }
 0xbb8   :  { %v1229_v47 = vadd.f32 %v1226_v46, %v1143_v42 }
 0xbba   :  { %v1237_v48 = vsel %vm106_vm1, %v1229_v47, 0.0 }
 0xbbb   :  { %1238 = vadd.xlane.f32.xlu1 %v1237_v48  ;;  %v2126_v48 = vld [vmem:[%s3006_s5 + $0x2] ss:$0 sm:$0xff] }
 0xc26   :  { %v1236_v49 = vpop.xlane.xlu2 %1235 }
 0xc27   :  { %v1240_v50 = vmul.f32 %v1236_v49, %v2514_v40 }
 0xc29   :  { %v2760_v51 = vsub.f32 %v1228_v44, %v1240_v50 }
 0xc2b   :  { %v1244_v52 = vmul.f32 %v2760_v51, %v2760_v51 }
 0xc2d   :  { %v1246_v31 = vsel %vm106_vm1, %v1244_v52, 0.0  ;;  %v2128_v52 = vld [vmem:[%s3035_s3 + $0x2] ss:$0 sm:$0xff] }
 0xc2e   :  { %1247 = vadd.xlane.f32.xlu1 %v1246_v31  ;;  %v1239_v53 = vpop.xlane.xlu1 %1238 }
 0xc2f   :  { %v1241_v54 = vmul.f32 %v1239_v53, %v2514_v40 }
 0xc31   :  { %v2766_v55 = vsub.f32 %v1229_v47, %v1241_v54 }
 0xc33   :  { %v1245_v37 = vmul.f32 %v2766_v55, %v2766_v55 }
 0xc35   :  { %v1249_v56 = vsel %vm106_vm1, %v1245_v37, 0.0 }
 0xc36   :  { %1250 = vadd.xlane.f32.xlu0 %v1249_v56 }
 0xca1   :  { %v1248_v12 = vpop.xlane.xlu1 %1247 }
 0xca2   :  { %v1252_v5 = vmul.f32 %v1248_v12, %v2514_v40 }
 0xca4   :  { %v1254_v13 = vadd.f32 1e-05, %v1252_v5  ;;  %v2212_v5 = vld [vmem:[%s3036_s22 + $0x8] sm:$0xff] }
 0xca6   :  { %2183 = vrsqrt.f32 %v1254_v13  ;;  %vm1262_vm10 = vweird.f32 %v1254_v13 }
 0xca9   :  { %v1251_v14 = vpop.xlane.xlu0 %1250 }
 0xcaa   :  { %v1253_v8 = vmul.f32 %v1251_v14, %v2514_v40 }
 0xcac   :  { %v2184_v34 = vpop.eup %2183  ;;  %v1255_v15 = vadd.f32 1e-05, %v1253_v8 }
 0xcad   :  { %v1257_v16 = vmul.f32 %v2184_v34, %v1254_v13  ;;  %vm1263_vm9 = vweird.f32 %v2184_v34 }
 0xcae   :  { %2185 = vrsqrt.f32 %v1255_v15  ;;  %vm1264_vm11 = vmor %vm1262_vm10, %vm1263_vm9  ;;  %vm1272_vm13 = vweird.f32 %v1255_v15 }
 0xcaf   :  { %v1258_v17 = vmul.f32 %v2184_v34, %v1257_v16 }
 0xcb1   :  { %v1259_v18 = vmul.f32 0.5, %v1258_v17 }
 0xcb3   :  { %v1260_v19 = vsub.f32 1.5, %v1259_v18 }
 0xcb4   :  { %v2186_v20 = vpop.eup %2185 }
 0xcb5   :  { %v1261_v21 = vmul.f32 %v2184_v34, %v1260_v19  ;;  %v1267_v23 = vmul.f32 %v2186_v20, %v1255_v15  ;;  %vm1273_vm12 = vweird.f32 %v2186_v20 }
 0xcb6   :  { %vm1274_vm14 = vmor %vm1272_vm13, %vm1273_vm12 }
 0xcb7   :  { %v1265_v25 = vsel %vm1264_vm11, %v2184_v34, %v1261_v21  ;;  %v1268_v42 = vmul.f32 %v2186_v20, %v1267_v23 }
 0xcb8   :  { %v1276_v26 = vmul.f32 %v1265_v25, %v2760_v51 }
 0xcb9   :  { %v1269_v29 = vmul.f32 0.5, %v1268_v42 }
 0xcba   :  { %v1281_v30 = vmul.f32 %v2124_v24, %v1276_v26 }
 0xcbb   :  { %v1270_v32 = vsub.f32 1.5, %v1269_v29 }
 0xcbc   :  { %v2829_v33 = vadd.f32 %v2125_v27, %v1281_v30 }
 0xcbd   :  { %v1271_v35 = vmul.f32 %v2186_v20, %v1270_v32 }
 0xcbe   :  { %2036 = vmatmul.msk.f32.vlgmr.msrb.gmra.mxu3 %vm106_vm1, %v2829_v33  ;;  %2045 = vmatmul.msk.f32.vlgmr.msrb.gmra.mxu0 %vm106_vm1, %v2829_v33 }
 0xcbf   :  { %v1275_v36 = vsel %vm1274_vm14, %v2186_v20, %v1271_v35  ;;  %2054 = vmatmul.msk.f32.vlgmr.msrb.gmra.mxu1 %vm106_vm1, %v2829_v33 }
 0xcc0   :  { %v1277_v38 = vmul.f32 %v1275_v36, %v2766_v55 }
 0xcc2   :  { %v1282_v39 = vmul.f32 %v2124_v24, %v1277_v38 }
 0xcc4   :  { %v2838_v9 = vadd.f32 %v2125_v27, %v1282_v39 }
 0xcc6   :  { %2037 = vmatmul.msk.f32.gmra.mxu3 %vm106_vm1, %v2838_v9  ;;  %2046 = vmatmul.msk.f32.vlgmr.msrb.gmra.mxu2 %vm106_vm1, %v2838_v9 }
 0xcc7   :  { %2055 = vmatmul.msk.f32.gmra.mxu1 %vm106_vm1, %v2838_v9 }
 0xd3b   :  { %v1362_v54 = vpop.f32.mrf.mxu0 }
 0xd3c   :  { %v1399_v41 = vpop.f32.mrf.mxu1  ;;  %v1363_v37 = vadd.f32 %v2126_v48, %v1362_v54 }
 0xd3d   :  { %v1400_v11 = vadd.f32 %v2127_v43, %v1399_v41  ;;  %v2072_v41 = vld [vmem:[%s3009_s8 + $0x70] sm:$0xf] }
 0xd3f   :  { %v1494_v50 = vmul.f32 %v2409_v22, %v1400_v11  ;;  %v1579_v51 = vmul.f32 %v2418_v28, %v1400_v11  ;;  %v2070_v11 = vld [vmem:[%s3009_s8 + $0x60] sm:$0xff] }
 0xd41   :  { %v1325_v49 = vpop.f32.mrf.mxu3 }
 0xd42   :  { %v1326_v55 = vadd.f32 %v2128_v52, %v1325_v49 }
 0xd44   :  { %v1402_v44 = vpop.f32.mrf.mxu1  ;;  %v1405_v56 = vmul.f32 %v2409_v22, %v1326_v55  ;;  %v1496_v57 = vmul.f32 %v2418_v28, %v1326_v55 }
 0xd45   :  { %v1403_v45 = vadd.f32 %v2127_v43, %v1402_v44  ;;  %v2071_v43 = vld [vmem:[%s3009_s8 + $0x68] sm:$0xff] }
 0xd47   :  { %v1495_v46 = vmul.f32 %v2409_v22, %v1403_v45  ;;  %v1580_v47 = vmul.f32 %v2418_v28, %v1403_v45 }
 0xd49   :  { %1601 = vmatpush.msra.mxu0 %v1580_v47  ;;  %1630 = vmatpush.msra.mxu1 %v1495_v46  ;;  %v1365_v31 = vpop.f32.mrf.mxu2  ;;  %v1328_v58 = vpop.f32.mrf.mxu3 }
 0xd4a   :  { %v1366_v53 = vadd.f32 %v2126_v48, %v1365_v31  ;;  %v1329_v59 = vadd.f32 %v2128_v52, %v1328_v58 }
 0xd4b   :  { %1602 = vmatpush.msra.mxu0 %v1579_v51  ;;  %1631 = vmatpush.msra.mxu1 %v1494_v50 }
 0xd4c   :  { %2056 = vmatpush.xpose.msk.msra.mxu2 %vm106_vm1, %v1366_v53  ;;  %2060 = vmatpush.xpose.msk.msra.mxu3 %vm106_vm1, %v1366_v53  ;;  %v1406_v60 = vmul.f32 %v2409_v22, %v1329_v59  ;;  %v1497_v61 = vmul.f32 %v2418_v28, %v1329_v59 }
 0xd50   :  { %2057 = vmatpush.xpose.msk.msra.mxu2 %vm106_vm1, %v1363_v37  ;;  %2061 = vmatpush.xpose.msk.msra.mxu3 %vm106_vm1, %v1363_v37 }
 0xd53   :  { %2058 = vmatmul.msk.f32.vlgmr.msra.gmra.mxu2 %vm106_vm1, %v1405_v56  ;;  %2062 = vmatmul.msk.f32.vlgmr.msra.gmra.mxu3 %vm106_vm1, %v1496_v57 }
 0xd54   :  { %2074 = vmatpush.msk.msrb.mxu2 %vm113_vm0, %v2072_v41 }
 0xd56   :  { %1671 = vmatpush.msrb.mxu2 %v2071_v43 }
 0xd58   :  { %1672 = vmatpush.msrb.mxu2 %v2070_v11 }
 0xd5b   :  { %2059 = vmatmul.msk.f32.gmra.mxu2 %vm106_vm1, %v1406_v60  ;;  %2063 = vmatmul.msk.f32.gmra.mxu3 %vm106_vm1, %v1497_v61 }
 0xdd6   :  { %v1436_v62 = vpop.f32.mrf.mxu2  ;;  %v1521_v63 = vpop.f32.mrf.mxu3 }
 0xdd7   :  { %v1442_v1 = vmul.f32 0.23570226, %v1436_v62  ;;  %v1527_v2 = vmul.f32 0.23570226, %v1521_v63 }
 0xdd9   :  { %v1529_v3 = vadd.f32 %v2211_v0, %v1527_v2  ;;  %v1444_v4 = vadd.f32 %v2211_v0, %v1442_v1 }
 0xddb   :  { %v1531_v6 = vsel %vm251_vm6, %v1529_v3, -inf  ;;  %v1446_v22 = vsel %vm251_vm6, %v1444_v4, -inf }
 0xddc   :  { %1532 = vmax.xlane.f32.xlu0 %v1531_v6  ;;  %1447 = vmax.xlane.f32.xlu2 %v1446_v22 }
 0xdde   :  { %v1439_v28 = vpop.f32.mrf.mxu2  ;;  %v1524_v7 = vpop.f32.mrf.mxu3 }
 0xddf   :  { %v1443_v10 = vmul.f32 0.23570226, %v1439_v28  ;;  %v1528_v12 = vmul.f32 0.23570226, %v1524_v7 }
 0xde1   :  { %v1530_v13 = vadd.f32 %v2212_v5, %v1528_v12  ;;  %v1445_v14 = vadd.f32 %v2212_v5, %v1443_v10 }
 0xde3   :  { %v1534_v8 = vsel %vm251_vm6, %v1530_v13, -inf  ;;  %v1449_v34 = vsel %vm251_vm6, %v1445_v14, -inf }
 0xde4   :  { %1535 = vmax.xlane.f32.xlu2 %v1534_v8  ;;  %1450 = vmax.xlane.f32.xlu1 %v1449_v34 }
 0xe4f   :  { %v1533_v15 = vpop.xlane.xlu0 %1532  ;;  %v1448_v16 = vpop.xlane.xlu2 %1447 }
 0xe50   :  { %v1537_v17 = vsub.f32 %v1529_v3, %v1533_v15  ;;  %v1452_v18 = vsub.f32 %v1444_v4, %v1448_v16 }
 0xe52   :  { %v1539_v19 = vmul.f32 1.442695, %v1537_v17  ;;  %v1454_v20 = vmul.f32 1.442695, %v1452_v18 }
 0xe54   :  { %2187 = vpow2.f32 %v1539_v19 }
 0xe55   :  { %2189 = vpow2.f32 %v1454_v20 }
 0xe57   :  { %v1536_v21 = vpop.xlane.xlu2 %1535  ;;  %v1451_v23 = vpop.xlane.xlu1 %1450 }
 0xe58   :  { %v1538_v24 = vsub.f32 %v1530_v13, %v1536_v21  ;;  %v1453_v25 = vsub.f32 %v1445_v14, %v1451_v23 }
 0xe5a   :  { %v2188_v42 = vpop.eup %2187  ;;  %v1541_v26 = vmul.f32 1.442695, %v1538_v24  ;;  %v1456_v27 = vmul.f32 1.442695, %v1453_v25 }
 0xe5b   :  { %v2190_v29 = vpop.eup %2189  ;;  %v1543_v30 = vsel %vm251_vm6, %v2188_v42, 0.0 }
 0xe5c   :  { %2191 = vpow2.f32 %v1541_v26  ;;  %v1458_v32 = vsel %vm251_vm6, %v2190_v29, 0.0  ;;  %1544 = vadd.xlane.f32.xlu1 %v1543_v30  ;;  %v2068_v26 = vld [vmem:[%s3009_s8 + $0x50] sm:$0xff] }
 0xe5d   :  { %2193 = vpow2.f32 %v1456_v27  ;;  %1459 = vadd.xlane.f32.xlu0 %v1458_v32 }
 0xe62   :  { %v2883_v35 = vpop.eup %2191 }
 0xe63   :  { %v2885_v36 = vpop.eup %2193  ;;  %v1546_v38 = vsel %vm251_vm6, %v2883_v35, 0.0 }
 0xe64   :  { %v1461_v39 = vsel %vm251_vm6, %v2885_v36, 0.0 }
 0xe65   :  { %1547 = vadd.xlane.f32.xlu0 %v1546_v38  ;;  %1462 = vadd.xlane.f32.xlu2 %v1461_v39  ;;  %v2129_v38 = vld [vmem:[%s3010_s9 + $0x2] ss:$0 sm:$0xff] }
 0xecf   :  { %v1545_v44 = vpop.xlane.xlu1 %1544 }
 0xed0   :  { %v1460_v45 = vpop.xlane.xlu0 %1459  ;;  %2195 = vrcp.f32 %v1545_v44  ;;  %v1560_v53 = vand.u32 2147483648, %v1545_v44  ;;  %v1558_v37 = vand.u32 2147483647, %v1545_v44  ;;  %vm1554_vm4 = vweird.f32 %v1545_v44 }
 0xed1   :  { %2197 = vrcp.f32 %v1460_v45  ;;  %v1475_v54 = vand.u32 2147483648, %v1460_v45  ;;  %v1473_v57 = vand.u32 2147483647, %v1460_v45  ;;  %vm1469_vm5 = vweird.f32 %v1460_v45 }
 0xed2   :  { %v1561_v60 = vor.u32 1.1754944e-38, %v1560_v53  ;;  %vm1559_vm9 = vcmp.eq.f32.partialorder %v1558_v37, 8.507059e+37  ;;  %v2082_v37 = vld [vmem:[%s3011_s10 + $0x68] sm:$0xff] }
 0xed3   :  { %v1476_v62 = vor.u32 1.1754944e-38, %v1475_v54  ;;  %vm1474_vm10 = vcmp.eq.f32.partialorder %v1473_v57, 8.507059e+37  ;;  %v2080_v57 = vld [vmem:[%s3011_s10 + $0x58] sm:$0xff] }
 0xed6   :  { %v2196_v46 = vpop.eup %2195 }
 0xed7   :  { %v2198_v47 = vpop.eup %2197  ;;  %v1550_v48 = vmul.f32 %v2196_v46, %v1545_v44  ;;  %vm1555_vm15 = vweird.f32 %v2196_v46 }
 0xed8   :  { %v1465_v49 = vmul.f32 %v2198_v47, %v1460_v45  ;;  %v1548_v50 = vpop.xlane.xlu0 %1547  ;;  %v1463_v51 = vpop.xlane.xlu2 %1462  ;;  %vm1470_vm2 = vweird.f32 %v2198_v47  ;;  %vm1556_vm7 = vmor %vm1554_vm4, %vm1555_vm15 }
 0xed9   :  { %v1551_v52 = vsub.f32 1.0, %v1550_v48  ;;  %2199 = vrcp.f32 %v1548_v50  ;;  %vm1471_vm8 = vmor %vm1469_vm5, %vm1470_vm2  ;;  %v1575_v10 = vand.u32 2147483648, %v1548_v50  ;;  %v1490_v13 = vand.u32 2147483648, %v1463_v51 }
 0xeda   :  { %v1466_v31 = vsub.f32 1.0, %v1465_v49  ;;  %2201 = vrcp.f32 %v1463_v51  ;;  %v1573_v14 = vand.u32 2147483647, %v1548_v50  ;;  %v1488_v34 = vand.u32 2147483647, %v1463_v51 }
 0xedb   :  { %v1552_v55 = vmul.f32 %v2196_v46, %v1551_v52  ;;  %vm1569_vm13 = vweird.f32 %v1548_v50  ;;  %v1576_v16 = vor.u32 1.1754944e-38, %v1575_v10  ;;  %vm1484_vm14 = vweird.f32 %v1463_v51  ;;  %v2130_v10 = vld [vmem:[%s3015_s14 + $0x2] ss:$0 sm:$0xff] }
 0xedc   :  { %v1467_v56 = vmul.f32 %v2198_v47, %v1466_v31  ;;  %v1491_v18 = vor.u32 1.1754944e-38, %v1490_v13  ;;  %vm1574_vm2 = vcmp.eq.f32.partialorder %v1573_v14, 8.507059e+37  ;;  %vm1489_vm5 = vcmp.eq.f32.partialorder %v1488_v34, 8.507059e+37 }
 0xedd   :  { %v1553_v58 = vadd.f32 %v2196_v46, %v1552_v55 }
 0xede   :  { %v1468_v59 = vadd.f32 %v2198_v47, %v1467_v56  ;;  %v2081_v56 = vld [vmem:[%s3011_s10 + $0x60] sm:$0xff] }
 0xedf   :  { %v2200_v61 = vpop.eup %2199  ;;  %v1557_v63 = vsel %vm1556_vm7, %v2196_v46, %v1553_v58  ;;  %v2079_v58 = vld [vmem:[%s3011_s10 + $0x50] sm:$0xff] }
 0xee0   :  { %v2202_v1 = vpop.eup %2201  ;;  %v1472_v2 = vsel %vm1471_vm8, %v2198_v47, %v1468_v59  ;;  %v1562_v0 = vsel %vm1559_vm9, %v1561_v60, %v1557_v63  ;;  %v1565_v3 = vmul.f32 %v2200_v61, %v1548_v50  ;;  %vm1570_vm11 = vweird.f32 %v2200_v61 }
 0xee1   :  { %v1477_v4 = vsel %vm1474_vm10, %v1476_v62, %v1472_v2  ;;  %v1480_v6 = vmul.f32 %v2202_v1, %v1463_v51  ;;  %v1563_v22 = vmul.f32 %v2188_v42, %v1562_v0  ;;  %vm1485_vm12 = vweird.f32 %v2202_v1  ;;  %vm1571_vm15 = vmor %vm1569_vm13, %vm1570_vm11  ;;  %v2069_v42 = vld [vmem:[%s3009_s8 + $0x58] sm:$0xff] }
 0xee2   :  { %v1566_v28 = vsub.f32 1.0, %v1565_v3  ;;  %v1478_v7 = vmul.f32 %v2190_v29, %v1477_v4  ;;  %vm1486_vm4 = vmor %vm1484_vm14, %vm1485_vm12  ;;  %1673 = vmatpush.msrb.mxu2 %v2069_v42  ;;  %v1791_v62 = vld [vmem:[#allocation2 + $0x58] sm:$0xff]  ;;  %v1788_v42 = vld [vmem:[#allocation2 + $0x40] sm:$0xff] }
 0xee3   :  { %v1481_v12 = vsub.f32 1.0, %v1480_v6  ;;  %2064 = vmatmul.msk.f32.vlgmr.msra.gmra.mxu0 %vm251_vm6, %v1563_v22 }
 0xee4   :  { %v1567_v5 = vmul.f32 %v2200_v61, %v1566_v28  ;;  %2066 = vmatmul.msk.f32.vlgmr.msra.gmra.mxu1 %vm251_vm6, %v1478_v7  ;;  %1674 = vmatpush.msrb.mxu2 %v2068_v26  ;;  %v2132_v26 = vld [vmem:[%s3012_s11 + $0x2] ss:$0 sm:$0xff] }
 0xee5   :  { %v1482_v8 = vmul.f32 %v2202_v1, %v1481_v12  ;;  %1815 = vmatpush.msrb.mxu0 %v1791_v62 }
 0xee6   :  { %v1568_v15 = vadd.f32 %v2200_v61, %v1567_v5 }
 0xee7   :  { %v1483_v17 = vadd.f32 %v2202_v1, %v1482_v8  ;;  %v2131_v8 = vld [vmem:[%s3016_s15 + $0x2] ss:$0 sm:$0xff] }
 0xee8   :  { %v1572_v19 = vsel %vm1571_vm15, %v2200_v61, %v1568_v15 }
 0xee9   :  { %v1577_v20 = vsel %vm1574_vm2, %v1576_v16, %v1572_v19  ;;  %v1487_v21 = vsel %vm1486_vm4, %v2202_v1, %v1483_v17 }
 0xeea   :  { %v1578_v23 = vmul.f32 %v2883_v35, %v1577_v20  ;;  %v1492_v24 = vsel %vm1489_vm5, %v1491_v18, %v1487_v21 }
 0xeeb   :  { %v1493_v25 = vmul.f32 %v2885_v36, %v1492_v24  ;;  %v1790_v24 = vld [vmem:[#allocation2 + $0x50] sm:$0xff] }
 0xeec   :  { %2065 = vmatmul.msk.f32.gmra.mxu0 %vm251_vm6, %v1578_v23 }
 0xeed   :  { %2067 = vmatmul.msk.f32.gmra.mxu1 %vm251_vm6, %v1493_v25  ;;  %1816 = vmatpush.msrb.mxu0 %v1790_v24  ;;  %v1789_v25 = vld [vmem:[#allocation2 + $0x48] sm:$0xff] }
 0xeef   :  { %1817 = vmatpush.msrb.mxu0 %v1789_v25 }
 0xef1   :  { %1818 = vmatpush.msrb.mxu0 %v1788_v42 }
 0xf60   :  { %v1604_v27 = vpop.f32.mrf.mxu0 }
 0xf61   :  { %v1633_v29 = vpop.f32.mrf.mxu1 }
 0xf62   :  { %v1634_v30 = vadd.f32 %v1633_v29, %v1604_v27 }
 0xf64   :  { %2075 = vmatmul.msk.f32.vlgmr.msrb.gmra.mxu2 %vm106_vm1, %v1634_v30 }
 0xf69   :  { %v1607_v32 = vpop.f32.mrf.mxu0 }
 0xf6a   :  { %v1636_v35 = vpop.f32.mrf.mxu1 }
 0xf6b   :  { %v1637_v36 = vadd.f32 %v1636_v35, %v1607_v32 }
 0xf6d   :  { %2076 = vmatmul.msk.f32.gmra.mxu2 %vm106_vm1, %v1637_v36 }
 0xfe7   :  { %v1676_v39 = vpop.f32.mrf.mxu2 }
 0xfe8   :  { %v1677_v41 = vadd.f32 %v2129_v38, %v1676_v39 }
 0xfea   :  { %v1682_v43 = vadd.f32 %v1677_v41, %v2829_v33 }
 0xfec   :  { %v1688_v44 = vsel %vm106_vm1, %v1682_v43, 0.0 }
 0xfed   :  { %1689 = vadd.xlane.f32.xlu1 %v1688_v44 }
 0xff0   :  { %v1679_v11 = vpop.f32.mrf.mxu2 }
 0xff1   :  { %v1680_v45 = vadd.f32 %v2129_v38, %v1679_v11  ;;  %v2133_v38 = vld [vmem:[%s3014_s13 + $0x2] ss:$0 sm:$0xff] }
 0xff3   :  { %v1683_v46 = vadd.f32 %v1680_v45, %v2838_v9  ;;  %v2083_v9 = vld [vmem:[%s3011_s10 + $0x70] sm:$0xf] }
 0xff4   :  { %2085 = vmatpush.msk.msrb.mxu3 %vm113_vm0, %v2083_v9  ;;  %v1890_v9 = vld [vmem:[%s3019_s18 + $0x20] sm:$0xf] }
 0xff5   :  { %v1691_v47 = vsel %vm106_vm1, %v1683_v46, 0.0  ;;  %2093 = vmatpush.msk.msrb.mxu1 %vm113_vm0, %v1890_v9 }
 0xff6   :  { %1692 = vadd.xlane.f32.xlu2 %v1691_v47  ;;  %1774 = vmatpush.msrb.mxu3 %v2082_v37  ;;  %v1889_v37 = vld [vmem:[%s3019_s18 + $0x18] sm:$0xff] }
 0xff7   :  { %1916 = vmatpush.msrb.mxu1 %v1889_v37 }
 0xff8   :  { %1775 = vmatpush.msrb.mxu3 %v2081_v56  ;;  %v1888_v56 = vld [vmem:[%s3019_s18 + $0x10] sm:$0xff] }
 0xff9   :  { %1917 = vmatpush.msrb.mxu1 %v1888_v56 }
 0xffa   :  { %1776 = vmatpush.msrb.mxu3 %v2080_v57  ;;  %v1887_v57 = vld [vmem:[%s3019_s18 + $0x8] sm:$0xff] }
 0xffb   :  { %1918 = vmatpush.msrb.mxu1 %v1887_v57 }
 0xffc   :  { %1777 = vmatpush.msrb.mxu3 %v2079_v58  ;;  %v1886_v58 = vld [vmem:[%s3019_s18] sm:$0xff] }
 0xffd   :  { %1919 = vmatpush.msrb.mxu1 %v1886_v58 }
0x1060   :  { %v1690_v48 = vpop.xlane.xlu1 %1689 }
0x1061   :  { %v1694_v49 = vmul.f32 %v1690_v48, %v2514_v40 }
0x1063   :  { %v1696_v50 = vsub.f32 %v1682_v43, %v1694_v49 }
0x1065   :  { %v1698_v51 = vmul.f32 %v1696_v50, %v1696_v50 }
0x1067   :  { %v1700_v52 = vsel %vm106_vm1, %v1698_v51, 0.0 }
0x1068   :  { %1701 = vadd.xlane.f32.xlu0 %v1700_v52 }
0x1069   :  { %v1693_v31 = vpop.xlane.xlu2 %1692 }
0x106a   :  { %v1695_v33 = vmul.f32 %v1693_v31, %v2514_v40 }
0x106c   :  { %v1697_v53 = vsub.f32 %v1683_v46, %v1695_v33 }
0x106e   :  { %v1699_v54 = vmul.f32 %v1697_v53, %v1697_v53 }
0x1070   :  { %v1703_v55 = vsel %vm106_vm1, %v1699_v54, 0.0 }
0x1071   :  { %1704 = vadd.xlane.f32.xlu1 %v1703_v55 }
0x10db   :  { %v1702_v59 = vpop.xlane.xlu0 %1701 }
0x10dc   :  { %v1706_v60 = vmul.f32 %v1702_v59, %v2514_v40 }
0x10de   :  { %v1708_v61 = vadd.f32 1e-05, %v1706_v60 }
0x10e0   :  { %2203 = vrsqrt.f32 %v1708_v61  ;;  %vm1716_vm7 = vweird.f32 %v1708_v61 }
0x10e4   :  { %v1705_v63 = vpop.xlane.xlu1 %1704 }
0x10e5   :  { %v1707_v1 = vmul.f32 %v1705_v63, %v2514_v40 }
0x10e6   :  { %v2204_v2 = vpop.eup %2203 }
0x10e7   :  { %v1711_v0 = vmul.f32 %v2204_v2, %v1708_v61  ;;  %v1709_v3 = vadd.f32 1e-05, %v1707_v1  ;;  %vm1717_vm6 = vweird.f32 %v2204_v2 }
0x10e8   :  { %vm1718_vm8 = vmor %vm1716_vm7, %vm1717_vm6 }
0x10e9   :  { %v1712_v4 = vmul.f32 %v2204_v2, %v1711_v0  ;;  %2205 = vrsqrt.f32 %v1709_v3  ;;  %vm1726_vm10 = vweird.f32 %v1709_v3 }
0x10eb   :  { %v1713_v6 = vmul.f32 0.5, %v1712_v4 }
0x10ed   :  { %v1714_v22 = vsub.f32 1.5, %v1713_v6 }
0x10ef   :  { %v2206_v28 = vpop.eup %2205  ;;  %v1715_v7 = vmul.f32 %v2204_v2, %v1714_v22 }
0x10f0   :  { %v1721_v12 = vmul.f32 %v2206_v28, %v1709_v3  ;;  %vm1727_vm9 = vweird.f32 %v2206_v28 }
0x10f1   :  { %v1719_v5 = vsel %vm1718_vm8, %v2204_v2, %v1715_v7  ;;  %vm1728_vm11 = vmor %vm1726_vm10, %vm1727_vm9  ;;  %v2134_v7 = vld [vmem:[%s3017_s16 + $0x2] ss:$0 sm:$0xff] }
0x10f2   :  { %v1730_v13 = vmul.f32 %v1719_v5, %v1696_v50  ;;  %v1722_v14 = vmul.f32 %v2206_v28, %v1721_v12 }
0x10f4   :  { %v1735_v34 = vmul.f32 %v2130_v10, %v1730_v13  ;;  %v1723_v15 = vmul.f32 0.5, %v1722_v14  ;;  %v2135_v13 = vld [vmem:[%s3018_s17 + $0x2] ss:$0 sm:$0xff] }
0x10f6   :  { %v1724_v16 = vsub.f32 1.5, %v1723_v15  ;;  %v1740_v17 = vadd.f32 %v2131_v8, %v1735_v34 }
0x10f8   :  { %v1725_v18 = vmul.f32 %v2206_v28, %v1724_v16  ;;  %2086 = vmatmul.msk.f32.vlgmr.msrb.gmra.mxu3 %vm106_vm1, %v1740_v17 }
0x10fa   :  { %v1729_v19 = vsel %vm1728_vm11, %v2206_v28, %v1725_v18 }
0x10fb   :  { %v1731_v20 = vmul.f32 %v1729_v19, %v1697_v53 }
0x10fd   :  { %v1736_v21 = vmul.f32 %v2130_v10, %v1731_v20 }
0x10ff   :  { %v1741_v23 = vadd.f32 %v2131_v8, %v1736_v21  ;;  %v2136_v21 = vld [vmem:[%s3020_s19] ss:$0 sm:$0xff] }
0x1101   :  { %2087 = vmatmul.msk.f32.gmra.mxu3 %vm106_vm1, %v1741_v23 }
0x117b   :  { %v1779_v27 = vpop.f32.mrf.mxu3 }
0x117c   :  { %v1780_v29 = vadd.f32 %v2132_v26, %v1779_v27 }
0x117e   :  { %v1785_v30 = vmax.f32 %v1780_v29, 0.0 }
0x1180   :  { %2089 = vmatmul.msk.f32.vlgmr.msrb.gmra.mxu0 %vm602_vm3, %v1785_v30 }
0x1184   :  { %v1782_v32 = vpop.f32.mrf.mxu3 }
0x1185   :  { %v1783_v35 = vadd.f32 %v2132_v26, %v1782_v32 }
0x1187   :  { %v1786_v36 = vmax.f32 %v1783_v35, 0.0 }
0x1189   :  { %2090 = vmatmul.msk.f32.gmra.mxu0 %vm602_vm3, %v1786_v36 }
0x11fd   :  { %v1820_v39 = vpop.f32.mrf.mxu0 }
0x11fe   :  { %v1821_v41 = vadd.f32 %v2133_v38, %v1820_v39 }
0x1200   :  { %v1826_v43 = vadd.f32 %v1821_v41, %v1740_v17 }
0x1202   :  { %v1832_v44 = vsel %vm106_vm1, %v1826_v43, 0.0 }
0x1203   :  { %1833 = vadd.xlane.f32.xlu2 %v1832_v44 }
0x1206   :  { %v1823_v11 = vpop.f32.mrf.mxu0 }
0x1207   :  { %v1824_v45 = vadd.f32 %v2133_v38, %v1823_v11 }
0x1209   :  { %v1827_v46 = vadd.f32 %v1824_v45, %v1741_v23 }
0x120b   :  { %v1835_v47 = vsel %vm106_vm1, %v1827_v46, 0.0 }
0x120c   :  { %1836 = vadd.xlane.f32.xlu0 %v1835_v47 }
0x1276   :  { %v1834_v48 = vpop.xlane.xlu2 %1833 }
0x1277   :  { %v1838_v49 = vmul.f32 %v1834_v48, %v2514_v40 }
0x1279   :  { %v1840_v50 = vsub.f32 %v1826_v43, %v1838_v49 }
0x127b   :  { %v1842_v51 = vmul.f32 %v1840_v50, %v1840_v50 }
0x127d   :  { %v1844_v52 = vsel %vm106_vm1, %v1842_v51, 0.0 }
0x127e   :  { %1845 = vadd.xlane.f32.xlu1 %v1844_v52 }
0x127f   :  { %v1837_v31 = vpop.xlane.xlu0 %1836 }
0x1280   :  { %v1839_v33 = vmul.f32 %v1837_v31, %v2514_v40 }
0x1282   :  { %v1841_v53 = vsub.f32 %v1827_v46, %v1839_v33 }
0x1284   :  { %v1843_v54 = vmul.f32 %v1841_v53, %v1841_v53 }
0x1286   :  { %v1847_v55 = vsel %vm106_vm1, %v1843_v54, 0.0 }
0x1287   :  { %1848 = vadd.xlane.f32.xlu2 %v1847_v55 }
0x12f1   :  { %v1846_v59 = vpop.xlane.xlu1 %1845 }
0x12f2   :  { %v1850_v60 = vmul.f32 %v1846_v59, %v2514_v40 }
0x12f4   :  { %v1852_v61 = vadd.f32 1e-05, %v1850_v60 }
0x12f6   :  { %2207 = vrsqrt.f32 %v1852_v61  ;;  %vm1860_vm3 = vweird.f32 %v1852_v61 }
0x12fa   :  { %v1849_v62 = vpop.xlane.xlu2 %1848 }
0x12fb   :  { %v1851_v63 = vmul.f32 %v1849_v62, %v2514_v40 }
0x12fc   :  { %v2208_v1 = vpop.eup %2207 }
0x12fd   :  { %v1855_v2 = vmul.f32 %v2208_v1, %v1852_v61  ;;  %v1853_v0 = vadd.f32 1e-05, %v1851_v63  ;;  %vm1861_vm0 = vweird.f32 %v2208_v1 }
0x12fe   :  { %vm1862_vm12 = vmor %vm1860_vm3, %vm1861_vm0 }
0x12ff   :  { %v1856_v3 = vmul.f32 %v2208_v1, %v1855_v2  ;;  %2209 = vrsqrt.f32 %v1853_v0  ;;  %vm1870_vm14 = vweird.f32 %v1853_v0 }
0x1301   :  { %v1857_v4 = vmul.f32 0.5, %v1856_v3 }
0x1303   :  { %v1858_v6 = vsub.f32 1.5, %v1857_v4 }
0x1305   :  { %v2210_v22 = vpop.eup %2209  ;;  %v1859_v28 = vmul.f32 %v2208_v1, %v1858_v6 }
0x1306   :  { %v1865_v10 = vmul.f32 %v2210_v22, %v1853_v0  ;;  %vm1871_vm13 = vweird.f32 %v2210_v22 }
0x1307   :  { %v1863_v12 = vsel %vm1862_vm12, %v2208_v1, %v1859_v28  ;;  %vm1872_vm15 = vmor %vm1870_vm14, %vm1871_vm13 }
0x1308   :  { %v1874_v5 = vmul.f32 %v1863_v12, %v1840_v50  ;;  %v1866_v40 = vmul.f32 %v2210_v22, %v1865_v10 }
0x130a   :  { %v1879_v14 = vmul.f32 %v2134_v7, %v1874_v5  ;;  %v1867_v8 = vmul.f32 0.5, %v1866_v40 }
0x130c   :  { %v1868_v34 = vsub.f32 1.5, %v1867_v8  ;;  %v1884_v15 = vadd.f32 %v2135_v13, %v1879_v14 }
0x130e   :  { %v1869_v16 = vmul.f32 %v2210_v22, %v1868_v34  ;;  %2094 = vmatmul.msk.f32.vlgmr.msrb.gmra.mxu1 %vm106_vm1, %v1884_v15 }
0x1310   :  { %v1873_v17 = vsel %vm1872_vm15, %v2210_v22, %v1869_v16 }
0x1311   :  { %v1875_v18 = vmul.f32 %v1873_v17, %v1841_v53 }
0x1313   :  { %v1880_v19 = vmul.f32 %v2134_v7, %v1875_v18 }
0x1315   :  { %v1885_v20 = vadd.f32 %v2135_v13, %v1880_v19 }
0x1317   :  { %2095 = vmatmul.msk.f32.gmra.mxu1 %vm106_vm1, %v1885_v20 }
0x138b   :  { %v1921_v23 = vpop.f32.mrf.mxu1 }
0x138c   :  { %v1922_v24 = vadd.f32 %v2136_v21, %v1921_v23 }
0x138e   :  { %1927 = vst [vmem:[%s3021_s20] sm:$0xff] %v1922_v24 }
0x1394   :  { %v1924_v25 = vpop.f32.mrf.mxu1 }
0x1395   :  { %v1925_v42 = vadd.f32 %v2136_v21, %v1924_v25 }
0x1397   :  { %1928 = vst [vmem:[%s3021_s20 + $0x8] sm:$0xff] %v1925_v42 }
0x1398   :  { %1933 = vsyncpa [#allocation3], 1 }

</bundles_post_ra>
